<compile_context>
chip_gen: v5e
topology: v5e:2x2
jax: 0.10.0
libtpu: 0.0.40
codegen_flags: <defaults>
</compile_context>

<pallas_src>
import functools

import numpy as np
import jax
import jax.numpy as jnp
from jax.experimental import pallas as pl
from jax.experimental.pallas import tpu as pltpu


# ----------------------------------------------------------------------------
# 1-D projection matrices (reproduce torch semantics exactly, kept in float32)
# ----------------------------------------------------------------------------
def _adaptive_avg_pool_matrix(in_size: int, out_size: int) -> np.ndarray:
    """Row-stochastic matrix reproducing torch adaptive_avg_pool1d windows."""
    m = np.zeros((out_size, in_size), dtype=np.float32)
    for i in range(out_size):
        start = (i * in_size) // out_size
        end = -((-(i + 1) * in_size) // out_size)  # ceil((i+1)*in/out)
        m[i, start:end] = 1.0 / (end - start)
    return m


def _bilinear_matrix(in_size: int, out_size: int) -> np.ndarray:
    """1-D bilinear resize matrix matching F.interpolate(align_corners=False)."""
    m = np.zeros((out_size, in_size), dtype=np.float32)
    scale = in_size / out_size
    for i in range(out_size):
        src = (i + 0.5) * scale - 0.5
        src = max(src, 0.0)
        i0 = min(int(np.floor(src)), in_size - 1)
        i1 = min(i0 + 1, in_size - 1)
        lam = src - i0
        m[i, i0] += 1.0 - lam
        m[i, i1] += lam
    return m


# ----------------------------------------------------------------------------
# Padded-layout VMEM model (review item: layout-aware footprint estimate)
# ----------------------------------------------------------------------------
def _round_up(x: int, m: int) -> int:
    return ((x + m - 1) // m) * m


def _padded_tile_bytes(shape, itemsize, sub_q):
    """Bytes a tile occupies in VMEM: last dim padded to 128 lanes,
    second-to-last to the dtype sublane quantum."""
    lead = 1
    for d in shape[:-2]:
        lead *= int(d)
    rows = _round_up(int(shape[-2]), sub_q)
    cols = _round_up(int(shape[-1]), 128)
    return lead * rows * cols * itemsize


def _estimate_vmem_bytes(tc, in_dims, out_hw, hw, hwp, itemsize, sub_q):
    """Conservative per-grid-step VMEM footprint for channel tile `tc`."""
    H, W = out_hw
    n_buf = 2  # default double buffering (kept deliberately — see header note)
    total = 0
    # Pipelined input blocks (folded (tc*h_in, w_in) slabs + x_s pass-through).
    for (h_in, w_in) in in_dims:
        total += n_buf * _padded_tile_bytes((tc * h_in, w_in), itemsize, sub_q)
    total += n_buf * _padded_tile_bytes((tc, hw), itemsize, sub_q)
    # Pipelined output block (4 concat sections, lane-padded spatial dim).
    total += n_buf * _padded_tile_bytes((4, tc, hwp), itemsize, sub_q)
    # Resident f32 projection matrices (constant index_map -> effectively one copy).
    for (h_in, w_in) in in_dims:
        total += _padded_tile_bytes((w_in, W), 4, 8)
        total += _padded_tile_bytes((H, h_in), 4, 8)
    # f32 in-kernel intermediates: t (tc,h_in,W), broadcast Ah (tc,H,h_in), y (tc,hwp).
    for (h_in, w_in) in in_dims:
        total += _padded_tile_bytes((tc, h_in, W), 4, 8)
        total += _padded_tile_bytes((tc, H, h_in), 4, 8)
        total += _padded_tile_bytes((tc, hwp), 4, 8)
    return total


def _vmem_capacity_bytes() -> int:
    """Per-TensorCore VMEM capacity; conservative (v7x) fallback if unavailable."""
    try:
        return int(pltpu.get_tpu_info().vmem_capacity_bytes)
    except Exception:
        return 64 << 20


def _pick_channel_tile(C, sub_q, budget, est_fn):
    """Largest channel tile whose PADDED footprint fits `budget`.

    Candidates are C itself plus sub_q-aligned divisors of C; if none fit,
    fall back to a sub_q-aligned non-divisor (cdiv grid, Pallas masks the
    partial tail block) instead of silently blowing the budget.
    """
    cands = [C] + [m for m in range(sub_q, C, sub_q) if C % m == 0]
    for tc in sorted(set(cands), reverse=True):
        if est_fn(tc) <= budget:
            return tc
    m = ((C - 1) // sub_q) * sub_q
    while m >= sub_q:
        if est_fn(m) <= budget:
            return m
        m -= sub_q
    return min(C, sub_q)


# ----------------------------------------------------------------------------
# Kernel
# ----------------------------------------------------------------------------
def _sim_fusion_kernel(xl_ref, xm_ref, xs_ref, xn_ref,
                       awl_ref, ahl_ref, awm_ref, ahm_ref, awn_ref, ahn_ref,
                       out_ref, *, tc, h_l, h_m, h_n, h, w, hw_pad):
    hw = h * w

    def pad_lanes(y):
        # Only taken when H*W is not a multiple of 128: append a zero tail so
        # the (tc, HWp) store stays a full, unmasked lane-dense block.
        if hw_pad:
            y = jnp.concatenate(
                [y, jnp.zeros((tc, hw_pad), dtype=y.dtype)], axis=-1)
        return y

    def resample(x_ref, aw_ref, ah_ref, h_in):
        # W contraction: one folded 2-D MXU matmul, M = tc*h_in, K = w_in, N = w.
        t = jnp.dot(x_ref[...], aw_ref[...], preferred_element_type=jnp.float32)
        t = t.reshape(tc, h_in, w)          # leading-dim split: free
        # H contraction: batched matmul consuming (tc, h_in, w) directly — w
        # stays on lanes, so no swapaxes transposes; only the final
        # (tc, h, w) -> (tc, h*w) lane merge remains.
        ah_b = jnp.broadcast_to(ah_ref[...], (tc,) + ah_ref.shape)   # hoisted once
        y = jax.lax.dot_general(
            ah_b, t,
            dimension_numbers=(((2,), (1,)), ((0,), (0,))),
            preferred_element_type=jnp.float32)                      # (tc, h, w)
        return pad_lanes(y.reshape(tc, hw))

    # out_ref block is (4, tc, HWp): one lane-dense slab per concat section.
    out_ref[0] = resample(xl_ref, awl_ref, ahl_ref, h_l).astype(out_ref.dtype)
    out_ref[1] = resample(xm_ref, awm_ref, ahm_ref, h_m).astype(out_ref.dtype)
    out_ref[2] = pad_lanes(xs_ref[...]).astype(out_ref.dtype)   # x_s pass-through
    out_ref[3] = resample(xn_ref, awn_ref, ahn_ref, h_n).astype(out_ref.dtype)


# ----------------------------------------------------------------------------
# Wrapper
# ----------------------------------------------------------------------------
def sim_fusion_4in(x_l, x_m, x_s, x_n, *,
                   vmem_budget_bytes=None, vmem_limit_bytes=None):
    B, C, H, W = x_s.shape
    Hl, Wl = x_l.shape[-2:]
    Hm, Wm = x_m.shape[-2:]
    Hn, Wn = x_n.shape[-2:]
    dt = x_s.dtype
    itemsize = int(np.dtype(dt).itemsize)
    sub_q = max(8, 8 * (4 // max(itemsize, 1)))   # 8 f32 / 16 bf16 / 32 int8

    HW = H * W
    HWp = _round_up(HW, 128)     # lane-dense (unmasked) output stores
    hw_pad = HWp - HW

    # Projection matrices kept in f32 for parity with the torch reference.
    aw_l = jnp.asarray(_adaptive_avg_pool_matrix(Wl, W).T)   # (Wl, W)
    ah_l = jnp.asarray(_adaptive_avg_pool_matrix(Hl, H))     # (H, Hl)
    aw_m = jnp.asarray(_adaptive_avg_pool_matrix(Wm, W).T)
    ah_m = jnp.asarray(_adaptive_avg_pool_matrix(Hm, H))
    aw_n = jnp.asarray(_bilinear_matrix(Wn, W).T)
    ah_n = jnp.asarray(_bilinear_matrix(Hn, H))

    # Chip-generation-aware VMEM budget / scoped limit.
    cap = _vmem_capacity_bytes()
    if vmem_limit_bytes is None:
        vmem_limit_bytes = min((cap * 3) // 4, 96 << 20)   # v7x: 48 MiB; v5e/v6e: 96 MiB
    if vmem_budget_bytes is None:
        vmem_budget_bytes = (vmem_limit_bytes * 2) // 3    # headroom for compiler scratch

    in_dims = ((Hl, Wl), (Hm, Wm), (Hn, Wn))
    est = functools.partial(_estimate_vmem_bytes, in_dims=in_dims, out_hw=(H, W),
                            hw=HW, hwp=HWp, itemsize=itemsize, sub_q=sub_q)
    tc = _pick_channel_tile(C, sub_q, vmem_budget_bytes, est)
    n_ct = -(-C // tc)

    # v7x has 2 TensorCores: make sure at least one "parallel" axis has >= 2
    # steps when alignment allows (x_s block needs tc % sub_q == 0 or tc == C).
    if B * n_ct < 2 and C % 2 == 0 and (C // 2) % sub_q == 0:
        tc = C // 2
        n_ct = 2

    # Never hand the compiler a limit smaller than what the chosen tile needs.
    need = est(tc)
    if need > int(vmem_limit_bytes * 0.9):
        vmem_limit_bytes = min(int(cap * 0.9), int(need * 1.25))

    # Lane-friendly flattened views (free reshapes: contiguous dims merged).
    xl2 = x_l.reshape(B, C * Hl, Wl)
    xm2 = x_m.reshape(B, C * Hm, Wm)
    xs2 = x_s.reshape(B, C, HW)
    xn2 = x_n.reshape(B, C * Hn, Wn)

    def folded_spec(h_in, w_in):
        # Channel tile c covers rows [c*tc*h_in, (c+1)*tc*h_in).
        return pl.BlockSpec((None, tc * h_in, w_in), lambda b, c: (b, c, 0))

    def mat_spec(r, k):
        # Full (untiled) projection matrix, same block every grid step.
        return pl.BlockSpec((r, k), lambda b, c: (0, 0))

    kernel = functools.partial(_sim_fusion_kernel, tc=tc,
                               h_l=Hl, h_m=Hm, h_n=Hn, h=H, w=W, hw_pad=hw_pad)

    out4 = pl.pallas_call(
        kernel,
        out_shape=jax.ShapeDtypeStruct((B, 4, C, HWp), dt),
        grid=(B, n_ct),
        in_specs=[
            folded_spec(Hl, Wl),                                   # x_l
            folded_spec(Hm, Wm),                                   # x_m
            pl.BlockSpec((None, tc, HW), lambda b, c: (b, c, 0)),  # x_s
            folded_spec(Hn, Wn),                                   # x_n
            mat_spec(Wl, W), mat_spec(H, Hl),
            mat_spec(Wm, W), mat_spec(H, Hm),
            mat_spec(Wn, W), mat_spec(H, Hn),
        ],
        out_specs=pl.BlockSpec((None, 4, tc, HWp), lambda b, c: (b, 0, c, 0)),
        compiler_params=pltpu.CompilerParams(
            dimension_semantics=("parallel", "parallel"),
            vmem_limit_bytes=int(vmem_limit_bytes)),
    )(xl2, xm2, xs2, xn2, aw_l, ah_l, aw_m, ah_m, aw_n, ah_n)

    if hw_pad:
        out4 = out4[..., :HW]
    # (B, 4, C, H*W) -> (B, 4*C, H, W): exactly concat([yl, ym, xs, yn], dim=1).
    return out4.reshape(B, 4 * C, H, W)


# ----------------------------------------------------------------------------
# Pure-JAX reference and self-test
# ----------------------------------------------------------------------------
def _reference(x_l, x_m, x_s, x_n):
    B, C, H, W = x_s.shape

    def apply(x, ah_np, aw_np):
        return jnp.einsum('ph,bchw,qw->bcpq', jnp.asarray(ah_np), x,
                          jnp.asarray(aw_np))

    yl = apply(x_l, _adaptive_avg_pool_matrix(x_l.shape[2], H),
               _adaptive_avg_pool_matrix(x_l.shape[3], W))
    ym = apply(x_m, _adaptive_avg_pool_matrix(x_m.shape[2], H),
               _adaptive_avg_pool_matrix(x_m.shape[3], W))
    yn = apply(x_n, _bilinear_matrix(x_n.shape[2], H),
               _bilinear_matrix(x_n.shape[3], W))
    return jnp.concatenate([yl, ym, x_s, yn], axis=1)


if __name__ == "__main__":
    # x_s defines the target (H, W); x_l / x_m are larger maps, x_n smaller.
    B, C, H, W = 2, 4, 16, 16
    key = jax.random.PRNGKey(0)
    k_l, k_m, k_s, k_n = jax.random.split(key, 4)
    x_l = jax.random.normal(k_l, (B, C, 4 * H, 4 * W), dtype=jnp.float32)
    x_m = jax.random.normal(k_m, (B, C, 2 * H, 2 * W), dtype=jnp.float32)
    x_s = jax.random.normal(k_s, (B, C, H, W), dtype=jnp.float32)
    x_n = jax.random.normal(k_n, (B, C, H // 2, W // 2), dtype=jnp.float32)

    out = jax.block_until_ready(sim_fusion_4in(x_l, x_m, x_s, x_n))
    ref = jax.block_until_ready(_reference(x_l, x_m, x_s, x_n))

    assert out.shape == (B, 4 * C, H, W), out.shape
    assert jnp.allclose(out, ref, atol=1e-4, rtol=1e-5), "mismatch vs reference"

    print("KERNEL_OK")
</pallas_src>

<mosaic_0001>
module attributes {stable_mosaic.version = 11 : i64} {
  func.func @_sim_fusion_kernel(%arg0: i32, %arg1: i32, %arg2: memref<1x256x64xf32, #tpu.memory_space<vmem>>, %arg3: memref<1x128x32xf32, #tpu.memory_space<vmem>>, %arg4: memref<1x4x256xf32, #tpu.memory_space<vmem>>, %arg5: memref<1x32x8xf32, #tpu.memory_space<vmem>>, %arg6: memref<64x16xf32, #tpu.memory_space<vmem>>, %arg7: memref<16x64xf32, #tpu.memory_space<vmem>>, %arg8: memref<32x16xf32, #tpu.memory_space<vmem>>, %arg9: memref<16x32xf32, #tpu.memory_space<vmem>>, %arg10: memref<8x16xf32, #tpu.memory_space<vmem>>, %arg11: memref<16x8xf32, #tpu.memory_space<vmem>>, %arg12: memref<1x4x4x256xf32, #tpu.memory_space<vmem>>) attributes {dimension_semantics = [#tpu.dimension_semantics<parallel>, #tpu.dimension_semantics<parallel>], iteration_bounds = array<i64: 2, 1>, scalar_prefetch = 0 : i64, scratch_operands = 0 : i64, tpu.core_type = #tpu.core_type<tc>, window_params = [{transform_indices = @transform_0, window_bounds = array<i64: 1, 256, 64>}, {transform_indices = @transform_1, window_bounds = array<i64: 1, 128, 32>}, {transform_indices = @transform_2, window_bounds = array<i64: 1, 4, 256>}, {transform_indices = @transform_3, window_bounds = array<i64: 1, 32, 8>}, {pipeline_mode = #tpu.pipeline_mode<synchronous>, transform_indices = @transform_4, window_bounds = array<i64: 64, 16>}, {pipeline_mode = #tpu.pipeline_mode<synchronous>, transform_indices = @transform_5, window_bounds = array<i64: 16, 64>}, {pipeline_mode = #tpu.pipeline_mode<synchronous>, transform_indices = @transform_6, window_bounds = array<i64: 32, 16>}, {pipeline_mode = #tpu.pipeline_mode<synchronous>, transform_indices = @transform_7, window_bounds = array<i64: 16, 32>}, {pipeline_mode = #tpu.pipeline_mode<synchronous>, transform_indices = @transform_8, window_bounds = array<i64: 8, 16>}, {pipeline_mode = #tpu.pipeline_mode<synchronous>, transform_indices = @transform_9, window_bounds = array<i64: 16, 8>}, {transform_indices = @transform_10, window_bounds = array<i64: 1, 4, 4, 256>}]} {
    %c0 = arith.constant 0 : index
    %c0_0 = arith.constant 0 : index
    %c0_1 = arith.constant 0 : index
    %0 = vector.load %arg2[%c0, %c0_0, %c0_1] : memref<1x256x64xf32, #tpu.memory_space<vmem>>, vector<1x256x64xf32>
    %1 = vector.shape_cast %0 : vector<1x256x64xf32> to vector<256x64xf32>
    %c0_2 = arith.constant 0 : index
    %c0_3 = arith.constant 0 : index
    %2 = vector.load %arg6[%c0_2, %c0_3] : memref<64x16xf32, #tpu.memory_space<vmem>>, vector<64x16xf32>
    %cst = arith.constant dense<0.000000e+00> : vector<256x16xf32>
    %3 = tpu.matmul %1, %2, %cst {dimension_numbers = #tpu.dot_dimension_numbers<[1], [0], [0], [1], [0, 0, 1, 1], [], []>} : vector<256x64xf32>, vector<64x16xf32>, vector<256x16xf32> -> vector<256x16xf32>
    %4 = vector.shape_cast %3 : vector<256x16xf32> to vector<4x64x16xf32>
    %c0_4 = arith.constant 0 : index
    %c0_5 = arith.constant 0 : index
    %5 = vector.load %arg7[%c0_4, %c0_5] : memref<16x64xf32, #tpu.memory_space<vmem>>, vector<16x64xf32>
    %6 = vector.shape_cast %5 : vector<16x64xf32> to vector<1x16x64xf32>
    %7 = vector.broadcast %6 : vector<1x16x64xf32> to vector<4x16x64xf32>
    %cst_6 = arith.constant dense<0.000000e+00> : vector<4x16x16xf32>
    %8 = tpu.matmul %7, %4, %cst_6 {dimension_numbers = #tpu.dot_dimension_numbers<[2], [1], [1], [2], [0, 0, 0, 1, 1, 2], [0], [0]>} : vector<4x16x64xf32>, vector<4x64x16xf32>, vector<4x16x16xf32> -> vector<4x16x16xf32>
    %9 = vector.shape_cast %8 : vector<4x16x16xf32> to vector<4x256xf32>
    %c0_7 = arith.constant 0 : index
    %c0_8 = arith.constant 0 : index
    %c0_9 = arith.constant 0 : index
    %c0_10 = arith.constant 0 : index
    %10 = vector.load %arg12[%c0_7, %c0_8, %c0_9, %c0_10] : memref<1x4x4x256xf32, #tpu.memory_space<vmem>>, vector<1x1x4x256xf32>
    %11 = vector.shape_cast %10 : vector<1x1x4x256xf32> to vector<4x256xf32>
    %12 = vector.shape_cast %9 : vector<4x256xf32> to vector<1x1x4x256xf32>
    tpu.vector_store %arg12[%c0_7, %c0_8, %c0_9, %c0_10], %12 {strides = array<i32>} : memref<1x4x4x256xf32, #tpu.memory_space<vmem>>, vector<1x1x4x256xf32>,
    %c0_11 = arith.constant 0 : index
    %c0_12 = arith.constant 0 : index
    %c0_13 = arith.constant 0 : index
    %13 = vector.load %arg3[%c0_11, %c0_12, %c0_13] : memref<1x128x32xf32, #tpu.memory_space<vmem>>, vector<1x128x32xf32>
    %14 = vector.shape_cast %13 : vector<1x128x32xf32> to vector<128x32xf32>
    %c0_14 = arith.constant 0 : index
    %c0_15 = arith.constant 0 : index
    %15 = vector.load %arg8[%c0_14, %c0_15] : memref<32x16xf32, #tpu.memory_space<vmem>>, vector<32x16xf32>
    %cst_16 = arith.constant dense<0.000000e+00> : vector<128x16xf32>
    %16 = tpu.matmul %14, %15, %cst_16 {dimension_numbers = #tpu.dot_dimension_numbers<[1], [0], [0], [1], [0, 0, 1, 1], [], []>} : vector<128x32xf32>, vector<32x16xf32>, vector<128x16xf32> -> vector<128x16xf32>
    %17 = vector.shape_cast %16 : vector<128x16xf32> to vector<4x32x16xf32>
    %c0_17 = arith.constant 0 : index
    %c0_18 = arith.constant 0 : index
    %18 = vector.load %arg9[%c0_17, %c0_18] : memref<16x32xf32, #tpu.memory_space<vmem>>, vector<16x32xf32>
    %19 = vector.shape_cast %18 : vector<16x32xf32> to vector<1x16x32xf32>
    %20 = vector.broadcast %19 : vector<1x16x32xf32> to vector<4x16x32xf32>
    %cst_19 = arith.constant dense<0.000000e+00> : vector<4x16x16xf32>
    %21 = tpu.matmul %20, %17, %cst_19 {dimension_numbers = #tpu.dot_dimension_numbers<[2], [1], [1], [2], [0, 0, 0, 1, 1, 2], [0], [0]>} : vector<4x16x32xf32>, vector<4x32x16xf32>, vector<4x16x16xf32> -> vector<4x16x16xf32>
    %22 = vector.shape_cast %21 : vector<4x16x16xf32> to vector<4x256xf32>
    %c0_20 = arith.constant 0 : index
    %c1 = arith.constant 1 : index
    %c0_21 = arith.constant 0 : index
    %c0_22 = arith.constant 0 : index
    %23 = vector.load %arg12[%c0_20, %c1, %c0_21, %c0_22] : memref<1x4x4x256xf32, #tpu.memory_space<vmem>>, vector<1x1x4x256xf32>
    %24 = vector.shape_cast %23 : vector<1x1x4x256xf32> to vector<4x256xf32>
    %25 = vector.shape_cast %22 : vector<4x256xf32> to vector<1x1x4x256xf32>
    tpu.vector_store %arg12[%c0_20, %c1, %c0_21, %c0_22], %25 {strides = array<i32>} : memref<1x4x4x256xf32, #tpu.memory_space<vmem>>, vector<1x1x4x256xf32>,
    %c0_23 = arith.constant 0 : index
    %c0_24 = arith.constant 0 : index
    %c0_25 = arith.constant 0 : index
    %26 = vector.load %arg4[%c0_23, %c0_24, %c0_25] : memref<1x4x256xf32, #tpu.memory_space<vmem>>, vector<1x4x256xf32>
    %27 = vector.shape_cast %26 : vector<1x4x256xf32> to vector<4x256xf32>
    %c0_26 = arith.constant 0 : index
    %c2 = arith.constant 2 : index
    %c0_27 = arith.constant 0 : index
    %c0_28 = arith.constant 0 : index
    %28 = vector.load %arg12[%c0_26, %c2, %c0_27, %c0_28] : memref<1x4x4x256xf32, #tpu.memory_space<vmem>>, vector<1x1x4x256xf32>
    %29 = vector.shape_cast %28 : vector<1x1x4x256xf32> to vector<4x256xf32>
    %30 = vector.shape_cast %27 : vector<4x256xf32> to vector<1x1x4x256xf32>
    tpu.vector_store %arg12[%c0_26, %c2, %c0_27, %c0_28], %30 {strides = array<i32>} : memref<1x4x4x256xf32, #tpu.memory_space<vmem>>, vector<1x1x4x256xf32>,
    %c0_29 = arith.constant 0 : index
    %c0_30 = arith.constant 0 : index
    %c0_31 = arith.constant 0 : index
    %31 = vector.load %arg5[%c0_29, %c0_30, %c0_31] : memref<1x32x8xf32, #tpu.memory_space<vmem>>, vector<1x32x8xf32>
    %32 = vector.shape_cast %31 : vector<1x32x8xf32> to vector<32x8xf32>
    %c0_32 = arith.constant 0 : index
    %c0_33 = arith.constant 0 : index
    %33 = vector.load %arg10[%c0_32, %c0_33] : memref<8x16xf32, #tpu.memory_space<vmem>>, vector<8x16xf32>
    %cst_34 = arith.constant dense<0.000000e+00> : vector<32x16xf32>
    %34 = tpu.matmul %32, %33, %cst_34 {dimension_numbers = #tpu.dot_dimension_numbers<[1], [0], [0], [1], [0, 0, 1, 1], [], []>} : vector<32x8xf32>, vector<8x16xf32>, vector<32x16xf32> -> vector<32x16xf32>
    %35 = vector.shape_cast %34 : vector<32x16xf32> to vector<4x8x16xf32>
    %c0_35 = arith.constant 0 : index
    %c0_36 = arith.constant 0 : index
    %36 = vector.load %arg11[%c0_35, %c0_36] : memref<16x8xf32, #tpu.memory_space<vmem>>, vector<16x8xf32>
    %37 = vector.shape_cast %36 : vector<16x8xf32> to vector<1x16x8xf32>
    %38 = vector.broadcast %37 : vector<1x16x8xf32> to vector<4x16x8xf32>
    %cst_37 = arith.constant dense<0.000000e+00> : vector<4x16x16xf32>
    %39 = tpu.matmul %38, %35, %cst_37 {dimension_numbers = #tpu.dot_dimension_numbers<[2], [1], [1], [2], [0, 0, 0, 1, 1, 2], [0], [0]>} : vector<4x16x8xf32>, vector<4x8x16xf32>, vector<4x16x16xf32> -> vector<4x16x16xf32>
    %40 = vector.shape_cast %39 : vector<4x16x16xf32> to vector<4x256xf32>
    %c0_38 = arith.constant 0 : index
    %c3 = arith.constant 3 : index
    %c0_39 = arith.constant 0 : index
    %c0_40 = arith.constant 0 : index
    %41 = vector.load %arg12[%c0_38, %c3, %c0_39, %c0_40] : memref<1x4x4x256xf32, #tpu.memory_space<vmem>>, vector<1x1x4x256xf32>
    %42 = vector.shape_cast %41 : vector<1x1x4x256xf32> to vector<4x256xf32>
    %43 = vector.shape_cast %40 : vector<4x256xf32> to vector<1x1x4x256xf32>
    tpu.vector_store %arg12[%c0_38, %c3, %c0_39, %c0_40], %43 {strides = array<i32>} : memref<1x4x4x256xf32, #tpu.memory_space<vmem>>, vector<1x1x4x256xf32>,
    return
  }
  func.func @transform_0(%arg0: i32, %arg1: i32) -> (i32, i32, i32) {
    %c0_i32 = arith.constant 0 : i32
    %c0_i32_0 = arith.constant 0 : i32
    return %arg0, %arg1, %c0_i32 : i32, i32, i32
  }
  func.func @transform_1(%arg0: i32, %arg1: i32) -> (i32, i32, i32) {
    %c0_i32 = arith.constant 0 : i32
    %c0_i32_0 = arith.constant 0 : i32
    return %arg0, %arg1, %c0_i32 : i32, i32, i32
  }
  func.func @transform_2(%arg0: i32, %arg1: i32) -> (i32, i32, i32) {
    %c0_i32 = arith.constant 0 : i32
    %c0_i32_0 = arith.constant 0 : i32
    return %arg0, %arg1, %c0_i32 : i32, i32, i32
  }
  func.func @transform_3(%arg0: i32, %arg1: i32) -> (i32, i32, i32) {
    %c0_i32 = arith.constant 0 : i32
    %c0_i32_0 = arith.constant 0 : i32
    return %arg0, %arg1, %c0_i32 : i32, i32, i32
  }
  func.func @transform_4(%arg0: i32, %arg1: i32) -> (i32, i32) {
    %c0_i32 = arith.constant 0 : i32
    %c0_i32_0 = arith.constant 0 : i32
    %c0_i32_1 = arith.constant 0 : i32
    return %c0_i32, %c0_i32_0 : i32, i32
  }
  func.func @transform_5(%arg0: i32, %arg1: i32) -> (i32, i32) {
    %c0_i32 = arith.constant 0 : i32
    %c0_i32_0 = arith.constant 0 : i32
    %c0_i32_1 = arith.constant 0 : i32
    return %c0_i32, %c0_i32_0 : i32, i32
  }
  func.func @transform_6(%arg0: i32, %arg1: i32) -> (i32, i32) {
    %c0_i32 = arith.constant 0 : i32
    %c0_i32_0 = arith.constant 0 : i32
    %c0_i32_1 = arith.constant 0 : i32
    return %c0_i32, %c0_i32_0 : i32, i32
  }
  func.func @transform_7(%arg0: i32, %arg1: i32) -> (i32, i32) {
    %c0_i32 = arith.constant 0 : i32
    %c0_i32_0 = arith.constant 0 : i32
    %c0_i32_1 = arith.constant 0 : i32
    return %c0_i32, %c0_i32_0 : i32, i32
  }
  func.func @transform_8(%arg0: i32, %arg1: i32) -> (i32, i32) {
    %c0_i32 = arith.constant 0 : i32
    %c0_i32_0 = arith.constant 0 : i32
    %c0_i32_1 = arith.constant 0 : i32
    return %c0_i32, %c0_i32_0 : i32, i32
  }
  func.func @transform_9(%arg0: i32, %arg1: i32) -> (i32, i32) {
    %c0_i32 = arith.constant 0 : i32
    %c0_i32_0 = arith.constant 0 : i32
    %c0_i32_1 = arith.constant 0 : i32
    return %c0_i32, %c0_i32_0 : i32, i32
  }
  func.func @transform_10(%arg0: i32, %arg1: i32) -> (i32, i32, i32, i32) {
    %c0_i32 = arith.constant 0 : i32
    %c0_i32_0 = arith.constant 0 : i32
    %c0_i32_1 = arith.constant 0 : i32
    return %arg0, %c0_i32, %arg1, %c0_i32_0 : i32, i32, i32, i32
  }
}

</mosaic_0001>

<bundles_post_ra>
// kernel: tpu_custom_call.1
= control target key start
LH: loop header
LB: loop body
LE: loop exit
PB: predicated region body
PF: predicated region fallthrough
CT: control target
= control target key end

     0   :  { %s2870_s0 = inlined_call_operand.vmem [shape: f32[2,256,64], index: 0, kind: input, shape index: {}]   ;;  %s2871_s1 = inlined_call_operand.vmem [shape: f32[2,128,32], index: 1, kind: input, shape index: {}]   ;;  %s2872_s2 = inlined_call_operand.vmem [shape: f32[2,4,256], index: 2, kind: input, shape index: {}]   ;;  %s2873_s3 = inlined_call_operand.vmem [shape: f32[2,32,8], index: 3, kind: input, shape index: {}]   ;;  %s2874_s4 = inlined_call_operand.vmem [shape: f32[64,16], index: 4, kind: input, shape index: {}]   ;;  %s2875_s5 = inlined_call_operand.vmem [shape: f32[16,64], index: 5, kind: input, shape index: {}]   ;;  %s2876_s6 = inlined_call_operand.vmem [shape: f32[32,16], index: 6, kind: input, shape index: {}]   ;;  %s2877_s7 = inlined_call_operand.vmem [shape: f32[16,32], index: 7, kind: input, shape index: {}]   ;;  %s2878_s8 = inlined_call_operand.vmem [shape: f32[8,16], index: 8, kind: input, shape index: {}]   ;;  %s2879_s9 = inlined_call_operand.vmem [shape: f32[16,8], index: 9, kind: input, shape index: {}]   ;;  %s2880_s10 = inlined_call_operand.hbm [shape: f32[2,4,4,256], index: 10, kind: output, shape index: {}]  }
   0x1   :  { %2887 = sst [smem:[#allocation5_spill]] %s2870_s0 }
   0x2   :  { %15 = vsyncpa [#allocation3], 0 }
   0x3   :  { %17 = vsyncpa [#allocation3 + $0x1], 0  ;;  %s2294_s13 = smov 0   ;;  %s2296_s14 = smov 0  }
   0x4   :  { %s2298_s15 = smov 0   ;;  %s2300_s16 = smov 0  }
   0x5   :  { %s2302_s17 = smov 0   ;;  %s2304_s18 = smov 0  }
   0x6 LB: > { %s1955_s19 = sadd.s32 4294967295, %s2226_s18   ;;  %s1956_s20 = sadd.s32 4294967294, %s2226_s18   ;;  %s2226_s18 = sphi %s2304_s18, %s23_s18   ;;  %s2222_s17 = sphi %s2302_s17, %s2898_s17   ;;  %s2218_s16 = sphi %s2300_s16, %s2897_s16   ;;  %s2214_s15 = sphi %s2298_s15, %s2896_s15   ;;  %s2210_s14 = sphi %s2296_s14, %s2895_s14   ;;  %s2206_s13 = sphi %s2294_s13, %s2894_s13  }
   0x7   : > { %s35_s21 = sadd.s32 1, %s2222_s17  ;;  %s282_s22 = sadd.s32 1, %s2214_s15 }
   0x8   : > { %p37_p0 = scmp.ge.s32.totalorder %s35_s21, 2  ;;  %p292_p1 = scmp.ne.s32.totalorder %s2214_s15, %s2210_s14 }
   0x9   : > { %p293_p2 = scmp.eq.s32.totalorder %s1955_s19, 1  ;;  %p298_p3 = scmp.ne.s32.totalorder %s2210_s14, %s2206_s13 }
   0xa   : > { %s2900_s21 = smov (%p37_p0, %s35_s21), 0  ;;  %p299_p5 = scmp.eq.s32.totalorder %s1956_s20, 1 }
   0xb   : > { %p2334_p4 = por %p293_p2, %p292_p1  ;;  %s277_s24 = ssub.s32 %s2222_s17, %s2900_s21 }
   0xc   : > { %p1959_p6 = scmp.ge.s32.totalorder %s2226_s18, 1  ;;  %p280_p7 = scmp.eq.s32.totalorder %s277_s24, 0 }
   0xd   : > { %p2341_p8 = por %p299_p5, %p298_p3  ;;  %p386_p9 = scmp.lt.s32.totalorder %s2226_s18, 3 }
   0xe   : > { %s2347_s26 = scalar_select %p280_p7, %s2214_s15, %s282_s22  }
   0xf   : > { %p387_p10 = pnand %p1959_p6, %p386_p9 }
  0x10   : > { %p456_p11 = scmp.lt.s32.totalorder (!%p387_p10), %s2218_s16, 1  ;;  %s2890_s0 = sld [smem:[#allocation5_spill]] (!%p387_p10) }
  0x11   : > { %390 = sbr.rel (%p387_p10) target bundleno = 1020 (0x3fc), region = 60  ;;  %s2232_s27 = smov (!%p387_p10), 32  }
  0x12   : > { %s2233_s29 = smov (!%p387_p10), 48   ;;  %s2881_s30 = smov (!%p387_p10), 16  }
  0x13   : > { %s2885_s11 = smov (!%p387_p10), 112   ;;  %s2891_s12 = smov (!%p387_p10), 112  }
  0x14   : > { %s2893_s22 = smov (!%p387_p10), 16  }
  0x16   : > { %v533_v0 = vld [vmem:[%s2874_s4 + $0x38] sm:$0xff]  ;;  %v532_v1 = vld [vmem:[%s2874_s4 + $0x30] sm:$0xff]  ;;  %v531_v2 = vld [vmem:[%s2874_s4 + $0x28] sm:$0xff]  ;;  %s2360_s19 = scalar_select %p456_p11, %s2218_s16, 1  ;;  %vm534_vm0 = vcmask 523264   ;;  %vm1015_vm1 = vcmask 261120  }
  0x17   : > { %639 = vmatpush.msra.mxu0 %v533_v0  ;;  %2059 = vmatpush.msra.mxu3 %v533_v0  ;;  %v530_v3 = vld [vmem:[%s2874_s4 + $0x20] sm:$0xff]  ;;  %v529_v4 = vld [vmem:[%s2874_s4 + $0x18] sm:$0xff]  ;;  %v528_v5 = vld [vmem:[%s2874_s4 + $0x10] sm:$0xff]  ;;  %vm845_vm2 = vcmask 1047556   ;;  %vm1470_vm3 = vcmask 64512   ;;  %vm1013_vm4 = vcmask 130048  }
  0x18   : > { %2058 = vmatpush.msra.mxu1 %v533_v0  ;;  %s2053_s28 = sshll.u32 %s2360_s19, 8  ;;  %v527_v6 = vld [vmem:[%s2874_s4 + $0x8] sm:$0xff]  ;;  %v526_v7 = vld [vmem:[%s2874_s4] sm:$0xff]  ;;  %s2056_s20 = sshll.u32 %s2360_s19, 5  ;;  %vm1017_vm5 = vcmask 392192   ;;  %vm1020_vm6 = vcmask 654336  }
  0x19   : > { %640 = vmatpush.msra.mxu0 %v532_v1  ;;  %2061 = vmatpush.msra.mxu3 %v532_v1  ;;  %s2378_s24 = scalar_lea.vmem %s2890_s0, %s2053_s28  ;;  %v744_v0 = vld [vmem:[%s2875_s5] sm:$0xff]  ;;  %s2883_s28 = smov 80   ;;  %vm1022_vm7 = vcmask 785408   ;;  %vm1024_vm8 = vcmask 916480   ;;  %vm1036_vm9 = vcmask 1043456  }
  0x1a   : > { %2060 = vmatpush.msra.mxu1 %v532_v1  ;;  %v494_v8 = vld [vmem:[%s2378_s24] sm:$0xff]  ;;  %v519_v9 = vld [vmem:[%s2378_s24 + $0xc8] sm:$0xff]  ;;  %v520_v11 = vld [vmem:[%s2378_s24 + $0xd0] sm:$0xff] }
  0x1b   : > { %641 = vmatpush.msra.mxu0 %v531_v2  ;;  %2063 = vmatpush.msra.mxu3 %v531_v2  ;;  %v495_v10 = vld [vmem:[%s2378_s24 + $0x8] sm:$0xff]  ;;  %v496_v12 = vld [vmem:[%s2378_s24 + $0x10] sm:$0xff]  ;;  %v521_v13 = vld [vmem:[%s2378_s24 + $0xd8] sm:$0xff] }
  0x1c   : > { %2062 = vmatpush.msra.mxu1 %v531_v2  ;;  %v497_v14 = vld [vmem:[%s2378_s24 + $0x18] sm:$0xff]  ;;  %v522_v15 = vld [vmem:[%s2378_s24 + $0xe0] sm:$0xff]  ;;  %v523_v17 = vld [vmem:[%s2378_s24 + $0xe8] sm:$0xff] }
  0x1d   : > { %642 = vmatpush.msra.mxu0 %v530_v3  ;;  %2065 = vmatpush.msra.mxu3 %v530_v3  ;;  %v498_v16 = vld [vmem:[%s2378_s24 + $0x20] sm:$0xff]  ;;  %v513_v18 = vld [vmem:[%s2378_s24 + $0x98] sm:$0xff]  ;;  %v499_v19 = vld [vmem:[%s2378_s24 + $0x28] sm:$0xff] }
  0x1e   : > { %2064 = vmatpush.msra.mxu1 %v530_v3  ;;  %v524_v20 = vld [vmem:[%s2378_s24 + $0xf0] sm:$0xff]  ;;  %v514_v21 = vld [vmem:[%s2378_s24 + $0xa0] sm:$0xff]  ;;  %v525_v23 = vld [vmem:[%s2378_s24 + $0xf8] sm:$0xff] }
  0x1f   : > { %643 = vmatpush.msra.mxu0 %v529_v4  ;;  %2067 = vmatpush.msra.mxu3 %v529_v4  ;;  %v500_v22 = vld [vmem:[%s2378_s24 + $0x30] sm:$0xff]  ;;  %v515_v24 = vld [vmem:[%s2378_s24 + $0xa8] sm:$0xff]  ;;  %v501_v25 = vld [vmem:[%s2378_s24 + $0x38] sm:$0xff] }
  0x20   : > { %2066 = vmatpush.msra.mxu1 %v529_v4  ;;  %v516_v26 = vld [vmem:[%s2378_s24 + $0xb0] sm:$0xff]  ;;  %v502_v27 = vld [vmem:[%s2378_s24 + $0x40] sm:$0xff]  ;;  %v517_v28 = vld [vmem:[%s2378_s24 + $0xb8] sm:$0xff] }
  0x21   : > { %644 = vmatpush.msra.mxu0 %v528_v5  ;;  %2069 = vmatpush.msra.mxu3 %v528_v5  ;;  %v503_v29 = vld [vmem:[%s2378_s24 + $0x48] sm:$0xff]  ;;  %v504_v30 = vld [vmem:[%s2378_s24 + $0x50] sm:$0xff]  ;;  %v505_v31 = vld [vmem:[%s2378_s24 + $0x58] sm:$0xff] }
  0x22   : > { %2068 = vmatpush.msra.mxu1 %v528_v5  ;;  %v506_v32 = vld [vmem:[%s2378_s24 + $0x60] sm:$0xff]  ;;  %v507_v33 = vld [vmem:[%s2378_s24 + $0x68] sm:$0xff]  ;;  %v508_v35 = vld [vmem:[%s2378_s24 + $0x70] sm:$0xff] }
  0x23   : > { %645 = vmatpush.msra.mxu0 %v527_v6  ;;  %2071 = vmatpush.msra.mxu3 %v527_v6  ;;  %v518_v34 = vld [vmem:[%s2378_s24 + $0xc0] sm:$0xff]  ;;  %v509_v36 = vld [vmem:[%s2378_s24 + $0x78] sm:$0xff]  ;;  %v511_v40 = vld [vmem:[%s2378_s24 + $0x88] sm:$0xff] }
  0x24   : > { %2070 = vmatpush.msra.mxu1 %v527_v6  ;;  %v510_v38 = vld [vmem:[%s2378_s24 + $0x80] sm:$0xff]  ;;  %v512_v43 = vld [vmem:[%s2378_s24 + $0x90] sm:$0xff]  ;;  %v745_v2 = vld [vmem:[%s2875_s5 + $0x8] sm:$0xff]  ;;  %s2054_s24 = sshll.u32 %s2360_s19, 7 }
  0x25   : > { %646 = vmatpush.msra.mxu0 %v526_v7  ;;  %2073 = vmatpush.msra.mxu3 %v526_v7  ;;  %s2485_s0 = scalar_lea.vmem %s2871_s1, %s2054_s24  ;;  %s2231_s24 = smov 96  }
  0x26   : > { %1969 = vmatmul.msk.f32.vlgmr.msra.gmra.mxu0 %vm534_vm0, %v494_v8  ;;  %1994 = vmatmul.msk.f32.vlgmr.msra.gmra.mxu3 %vm534_vm0, %v519_v9 }
  0x27   : > { %2072 = vmatpush.msra.mxu1 %v526_v7 }
  0x28   : > { %1988 = vmatmul.msk.f32.vlgmr.msra.gmra.mxu1 %vm534_vm0, %v513_v18  ;;  %v1044_v18 = vld [vmem:[%s2485_s0 + $0x20] sm:$0xff] }
  0x2e   : > { %1970 = vmatmul.msk.f32.gmra.mxu0 %vm534_vm0, %v495_v10  ;;  %1995 = vmatmul.msk.f32.gmra.mxu3 %vm534_vm0, %v520_v11  ;;  %v1059_v10 = vld [vmem:[%s2876_s6 + $0x18] sm:$0xff]  ;;  %v1058_v11 = vld [vmem:[%s2876_s6 + $0x10] sm:$0xff] }
  0x30   : > { %1989 = vmatmul.msk.f32.gmra.mxu1 %vm534_vm0, %v514_v21  ;;  %v1047_v21 = vld [vmem:[%s2485_s0 + $0x38] sm:$0xff] }
  0x36   : > { %1971 = vmatmul.msk.f32.gmra.mxu0 %vm534_vm0, %v496_v12  ;;  %1996 = vmatmul.msk.f32.gmra.mxu3 %vm534_vm0, %v521_v13  ;;  %v1057_v12 = vld [vmem:[%s2876_s6 + $0x8] sm:$0xff]  ;;  %v1056_v13 = vld [vmem:[%s2876_s6] sm:$0xff] }
  0x38   : > { %1990 = vmatmul.msk.f32.gmra.mxu1 %vm534_vm0, %v515_v24  ;;  %v1050_v24 = vld [vmem:[%s2485_s0 + $0x50] sm:$0xff] }
  0x3e   : > { %1972 = vmatmul.msk.f32.gmra.mxu0 %vm534_vm0, %v497_v14  ;;  %1997 = vmatmul.msk.f32.gmra.mxu3 %vm534_vm0, %v522_v15  ;;  %v1040_v14 = vld [vmem:[%s2485_s0] sm:$0xff]  ;;  %v1041_v15 = vld [vmem:[%s2485_s0 + $0x8] sm:$0xff] }
  0x40   : > { %1991 = vmatmul.msk.f32.gmra.mxu1 %vm534_vm0, %v516_v26 }
  0x46   : > { %1973 = vmatmul.msk.f32.gmra.mxu0 %vm534_vm0, %v498_v16  ;;  %1998 = vmatmul.msk.f32.gmra.mxu3 %vm534_vm0, %v523_v17  ;;  %v1042_v16 = vld [vmem:[%s2485_s0 + $0x10] sm:$0xff]  ;;  %v1043_v17 = vld [vmem:[%s2485_s0 + $0x18] sm:$0xff] }
  0x48   : > { %1992 = vmatmul.msk.f32.gmra.mxu1 %vm534_vm0, %v517_v28  ;;  %v1053_v28 = vld [vmem:[%s2485_s0 + $0x68] sm:$0xff] }
  0x4e   : > { %1974 = vmatmul.msk.f32.gmra.mxu0 %vm534_vm0, %v499_v19  ;;  %1999 = vmatmul.msk.f32.gmra.mxu3 %vm534_vm0, %v524_v20  ;;  %v1045_v19 = vld [vmem:[%s2485_s0 + $0x28] sm:$0xff]  ;;  %v1046_v20 = vld [vmem:[%s2485_s0 + $0x30] sm:$0xff] }
  0x50   : > { %1993 = vmatmul.msk.f32.gmra.mxu1 %vm534_vm0, %v518_v34  ;;  %v2228_v34 = vmov 1983009808  }
  0x56   : > { %1975 = vmatmul.msk.f32.gmra.mxu0 %vm534_vm0, %v500_v22  ;;  %2000 = vmatmul.msk.f32.gmra.mxu3 %vm534_vm0, %v525_v23  ;;  %v1048_v22 = vld [vmem:[%s2485_s0 + $0x40] sm:$0xff]  ;;  %v1049_v23 = vld [vmem:[%s2485_s0 + $0x48] sm:$0xff] }
  0x5e   : > { %1976 = vmatmul.msk.f32.gmra.mxu0 %vm534_vm0, %v501_v25  ;;  %v1051_v25 = vld [vmem:[%s2485_s0 + $0x58] sm:$0xff] }
  0x66   : > { %1977 = vmatmul.msk.f32.gmra.mxu0 %vm534_vm0, %v502_v27  ;;  %v1052_v27 = vld [vmem:[%s2485_s0 + $0x60] sm:$0xff] }
  0x6e   : > { %1978 = vmatmul.msk.f32.gmra.mxu0 %vm534_vm0, %v503_v29 }
  0x76   : > { %1979 = vmatmul.msk.f32.gmra.mxu0 %vm534_vm0, %v504_v30 }
  0x7e   : > { %1980 = vmatmul.msk.f32.gmra.mxu0 %vm534_vm0, %v505_v31  ;;  %v1054_v31 = vld [vmem:[%s2485_s0 + $0x70] sm:$0xff] }
  0x86   : > { %1981 = vmatmul.msk.f32.gmra.mxu0 %vm534_vm0, %v506_v32 }
  0x8e   : > { %1982 = vmatmul.msk.f32.gmra.mxu0 %vm534_vm0, %v507_v33 }
  0x96   : > { %1983 = vmatmul.msk.f32.gmra.mxu0 %vm534_vm0, %v508_v35  ;;  %v850_v35 = vunpack.c.l.s4 %v2228_v34 }
  0x9e   : > { %1984 = vmatmul.msk.f32.gmra.mxu0 %vm534_vm0, %v509_v36 }
  0xa3   : > { %v648_v37 = vpop.f32.mrf.mxu0 }
  0xa5   : > { %v705_v48 = vpop.f32.mrf.mxu1 }
  0xa6   : > { %1985 = vmatmul.msk.f32.gmra.mxu0 %vm534_vm0, %v510_v38 }
  0xa9   : > { %v2444_v41 = vpop.f32.mrf.mxu3 }
  0xab   : > { %v651_v39 = vpop.f32.mrf.mxu0 }
  0xad   : > { %v708_v51 = vpop.f32.mrf.mxu1 }
  0xae   : > { %1986 = vmatmul.msk.f32.gmra.mxu0 %vm534_vm0, %v511_v40  ;;  %v1055_v40 = vld [vmem:[%s2485_s0 + $0x78] sm:$0xff]  ;;  %s2230_s0 = smov 64  }
  0xb1   : > { %v2449_v44 = vpop.f32.mrf.mxu3 }
  0xb3   : > { %v654_v42 = vpop.f32.mrf.mxu0 }
  0xb5   : > { %v711_v54 = vpop.f32.mrf.mxu1 }
  0xb6   : > { %1987 = vmatmul.msk.f32.gmra.mxu0 %vm534_vm0, %v512_v43 }
  0xb9   : > { %v2451_v46 = vpop.f32.mrf.mxu3 }
  0xbb   : > { %v657_v45 = vpop.f32.mrf.mxu0 }
  0xbd   : > { %v714_v57 = vpop.f32.mrf.mxu1 }
  0xc1   : > { %v732_v49 = vpop.f32.mrf.mxu3 }
  0xc3   : > { %v660_v47 = vpop.f32.mrf.mxu0 }
  0xc5   : > { %v717_v60 = vpop.f32.mrf.mxu1 }
  0xc6   : > { %806 = vmatpush.msrb.mxu3 %v717_v60 }
  0xc8   : > { %807 = vmatpush.msrb.mxu3 %v714_v57 }
  0xc9   : > { %v735_v53 = vpop.f32.mrf.mxu3 }
  0xca   : > { %808 = vmatpush.msrb.mxu3 %v711_v54 }
  0xcb   : > { %v663_v50 = vpop.f32.mrf.mxu0 }
  0xcc   : > { %809 = vmatpush.msrb.mxu3 %v708_v51 }
  0xcd   : > { %v720_v4 = vpop.f32.mrf.mxu1 }
  0xce   : > { %810 = vmatpush.msrb.mxu3 %v705_v48 }
  0xd1   : > { %v738_v56 = vpop.f32.mrf.mxu3 }
  0xd3   : > { %v666_v52 = vpop.f32.mrf.mxu0 }
  0xd9   : > { %v741_v59 = vpop.f32.mrf.mxu3 }
  0xdb   : > { %v669_v55 = vpop.f32.mrf.mxu0 }
  0xdc   : > { %760 = vmatpush.msrb.mxu1 %v669_v55 }
  0xde   : > { %761 = vmatpush.msrb.mxu1 %v666_v52 }
  0xe0   : > { %762 = vmatpush.msrb.mxu1 %v663_v50 }
  0xe2   : > { %763 = vmatpush.msrb.mxu1 %v660_v47 }
  0xe3   : > { %v672_v58 = vpop.f32.mrf.mxu0 }
  0xe4   : > { %764 = vmatpush.msrb.mxu1 %v657_v45 }
  0xe6   : > { %765 = vmatpush.msrb.mxu1 %v654_v42  ;;  %v2229_v42 = vmov 1934713408  }
  0xe7   : > { %v874_v43 = vunpack.c.l.s4 %v2229_v42 }
  0xe8   : > { %766 = vmatpush.msrb.mxu1 %v651_v39  ;;  %v2524_v39 = vunpack.c.0.s8 %v850_v35 }
  0xe9   : > { %v2532_v50 = vunpack.c.0.s8 %v874_v43 }
  0xea   : > { %767 = vmatpush.msrb.mxu1 %v648_v37 }
  0xeb   : > { %v675_v61 = vpop.f32.mrf.mxu0  ;;  %2001 = vmatmul.msk.f32.vlgmr.msrb.gmra.mxu1 %vm534_vm0, %v744_v0 }
  0xec   : > { %829 = vmatpush.msra.mxu1 %v741_v59 }
  0xee   : > { %830 = vmatpush.msra.mxu1 %v738_v56 }
  0xf0   : > { %831 = vmatpush.msra.mxu1 %v735_v53 }
  0xf2   : > { %832 = vmatpush.msra.mxu1 %v732_v49 }
  0xf3   : > { %v678_v62 = vpop.f32.mrf.mxu0  ;;  %2002 = vmatmul.msk.f32.gmra.mxu1 %vm534_vm0, %v745_v2 }
  0xf4   : > { %833 = vmatpush.msra.mxu1 %v2451_v46 }
  0xf6   : > { %834 = vmatpush.msra.mxu1 %v2449_v44 }
  0xf8   : > { %835 = vmatpush.msra.mxu1 %v2444_v41 }
  0xfa   : > { %836 = vmatpush.msra.mxu1 %v720_v4 }
  0xfb   : > { %v681_v63 = vpop.f32.mrf.mxu0  ;;  %2007 = vmatmul.msk.f32.vlgmr.msra.gmra.mxu1 %vm534_vm0, %v744_v0 }
 0x103   : > { %v684_v1 = vpop.f32.mrf.mxu0 }
 0x10b   : > { %v687_v3 = vpop.f32.mrf.mxu0 }
 0x113   : > { %v690_v5 = vpop.f32.mrf.mxu0 }
 0x11b   : > { %v693_v6 = vpop.f32.mrf.mxu0 }
 0x11c   : > { %783 = vmatpush.msra.mxu2 %v693_v6 }
 0x11e   : > { %784 = vmatpush.msra.mxu2 %v690_v5 }
 0x120   : > { %785 = vmatpush.msra.mxu2 %v687_v3 }
 0x122   : > { %786 = vmatpush.msra.mxu2 %v684_v1 }
 0x123   : > { %v696_v7 = vpop.f32.mrf.mxu0 }
 0x124   : > { %787 = vmatpush.msra.mxu2 %v681_v63 }
 0x126   : > { %788 = vmatpush.msra.mxu2 %v678_v62 }
 0x128   : > { %789 = vmatpush.msra.mxu2 %v675_v61 }
 0x12a   : > { %790 = vmatpush.msra.mxu2 %v672_v58 }
 0x12b   : > { %v699_v8 = vpop.f32.mrf.mxu0  ;;  %2003 = vmatmul.msk.f32.vlgmr.msra.gmra.mxu2 %vm534_vm0, %v744_v0 }
 0x12c   : > { %2074 = vmatpush.msrb.mxu2 %v741_v59 }
 0x12e   : > { %2075 = vmatpush.msrb.mxu2 %v738_v56 }
 0x130   : > { %2076 = vmatpush.msrb.mxu2 %v735_v53 }
 0x132   : > { %2077 = vmatpush.msrb.mxu2 %v732_v49 }
 0x133   : > { %v702_v9 = vpop.f32.mrf.mxu0  ;;  %2004 = vmatmul.msk.f32.gmra.mxu2 %vm534_vm0, %v745_v2 }
 0x134   : > { %2078 = vmatpush.msrb.mxu2 %v2451_v46  ;;  %811 = vmatpush.msrb.mxu3 %v702_v9 }
 0x136   : > { %2079 = vmatpush.msrb.mxu2 %v2449_v44  ;;  %812 = vmatpush.msrb.mxu3 %v699_v8 }
 0x138   : > { %2080 = vmatpush.msrb.mxu2 %v2444_v41  ;;  %813 = vmatpush.msrb.mxu3 %v696_v7 }
 0x139   : > { %2005 = vmatmul.msk.f32.vlgmr.msrb.gmra.mxu3 %vm534_vm0, %v744_v0 }
 0x13a   : > { %2081 = vmatpush.msrb.mxu2 %v720_v4 }
 0x13b   : > { %2008 = vmatmul.msk.f32.vlgmr.msrb.gmra.mxu2 %vm534_vm0, %v745_v2 }
 0x13c   : > { %1120 = vmatpush.msra.mxu2 %v1059_v10 }
 0x13e   : > { %1121 = vmatpush.msra.mxu2 %v1058_v11 }
 0x140   : > { %1122 = vmatpush.msra.mxu2 %v1057_v12 }
 0x141   : > { %2006 = vmatmul.msk.f32.gmra.mxu3 %vm534_vm0, %v745_v2 }
 0x142   : > { %1123 = vmatpush.msra.mxu2 %v1056_v13 }
 0x143   : > { %2009 = vmatmul.msk.f32.vlgmr.msra.gmra.mxu2 %vm1015_vm1, %v1040_v14 }
 0x14b   : > { %2010 = vmatmul.msk.f32.gmra.mxu2 %vm1015_vm1, %v1041_v15 }
 0x153   : > { %2011 = vmatmul.msk.f32.gmra.mxu2 %vm1015_vm1, %v1042_v16 }
 0x15b   : > { %2012 = vmatmul.msk.f32.gmra.mxu2 %vm1015_vm1, %v1043_v17 }
 0x163   : > { %2013 = vmatmul.msk.f32.gmra.mxu2 %vm1015_vm1, %v1044_v18 }
 0x168   : > { %v769_v26 = vpop.f32.mrf.mxu1 }
 0x169   : > { %v847_v41 = vrot.slane %v769_v26, 4 }
 0x16b   : > { %2014 = vmatmul.msk.f32.gmra.mxu2 %vm1015_vm1, %v1045_v19 }
 0x170   : > { %v2518_v29 = vpop.f32.mrf.mxu1 }
 0x171   : > { %v903_v60 = vrot.slane %v2518_v29, 4 }
 0x173   : > { %2015 = vmatmul.msk.f32.gmra.mxu2 %vm1015_vm1, %v1046_v20 }
 0x178   : > { %v838_v32 = vpop.f32.mrf.mxu1 }
 0x179   : > { %v857_v36 = vrot.slane %v838_v32, 4 }
 0x17b   : > { %2016 = vmatmul.msk.f32.gmra.mxu2 %vm1015_vm1, %v1047_v21 }
 0x183   : > { %2017 = vmatmul.msk.f32.gmra.mxu2 %vm1015_vm1, %v1048_v22 }
 0x18b   : > { %2018 = vmatmul.msk.f32.gmra.mxu2 %vm1015_vm1, %v1049_v23 }
 0x193   : > { %2019 = vmatmul.msk.f32.gmra.mxu2 %vm1015_vm1, %v1050_v24 }
 0x19b   : > { %2020 = vmatmul.msk.f32.gmra.mxu2 %vm1015_vm1, %v1051_v25 }
 0x1a3   : > { %2021 = vmatmul.msk.f32.gmra.mxu2 %vm1015_vm1, %v1052_v27 }
 0x1ab   : > { %2022 = vmatmul.msk.f32.gmra.mxu2 %vm1015_vm1, %v1053_v28 }
 0x1ae   : > { %v792_v30 = vpop.f32.mrf.mxu2 }
 0x1af   : > { %v859_v33 = vrot.slane %v792_v30, 4  ;;  %v858_v44 = vsel %vm845_vm2, %v857_v36, %v792_v30 }
 0x1b0   : > { %v864_v47 = vperm.slane %v858_v44, %v2524_v39 }
 0x1b1   : > { %v860_v38 = vsel %vm845_vm2, %v838_v32, %v859_v33 }
 0x1b2   : > { %v868_v45 = vperm.slane %v860_v38, %v2524_v39  ;;  %v869_v61 = vrot.slane %v864_v47, 4 }
 0x1b3   : > { %2023 = vmatmul.msk.f32.gmra.mxu2 %vm1015_vm1, %v1054_v31 }
 0x1b4   : > { %v881_v54 = vrot.slane %v868_v45, 4 }
 0x1b6   : > { %v795_v37 = vpop.f32.mrf.mxu2 }
 0x1b7   : > { %v915_v51 = vrot.slane %v795_v37, 4 }
 0x1bb   : > { %2024 = vmatmul.msk.f32.gmra.mxu2 %vm1015_vm1, %v1055_v40 }
 0x1bc   : > { %v815_v46 = vpop.f32.mrf.mxu3 }
 0x1bd   : > { %v844_v48 = vrot.slane %v815_v46, 4  ;;  %v848_v49 = vsel %vm845_vm2, %v815_v46, %v847_v41 }
 0x1be   : > { %v856_v52 = vperm.slane %v848_v49, %v2524_v39  ;;  %v841_v53 = vpop.f32.mrf.mxu2 }
 0x1bf   : > { %v846_v55 = vsel %vm845_vm2, %v844_v48, %v769_v26  ;;  %v916_v58 = vsel %vm845_vm2, %v841_v53, %v915_v51  ;;  %v913_v63 = vrot.slane %v841_v53, 4  ;;  %v1173_v53 = vld [vmem:[%s2877_s7] sm:$0xff] }
 0x1c0   : > { %v852_v56 = vperm.slane %v846_v55, %v2524_v39  ;;  %v883_v57 = vrot.slane %v856_v52, 4  ;;  %v882_v59 = vsel %vm845_vm2, %v881_v54, %v856_v52  ;;  %v924_v2 = vperm.slane %v916_v58, %v2524_v39  ;;  %v1174_v55 = vld [vmem:[%s2877_s7 + $0x8] sm:$0xff] }
 0x1c1   : > { %v888_v62 = vperm.slane %v882_v59, %v2532_v50  ;;  %v914_v10 = vsel %vm845_vm2, %v913_v63, %v795_v37 }
 0x1c2   : > { %v884_v0 = vsel %vm845_vm2, %v868_v45, %v883_v57  ;;  %v871_v1 = vrot.slane %v852_v56, 4  ;;  %v870_v4 = vsel %vm845_vm2, %v869_v61, %v852_v56  ;;  %v937_v14 = vrot.slane %v924_v2, 4 }
 0x1c3   : > { %970 = vrot.lane.b32.xlu1 %v888_v62, %s2230_s0  ;;  %v892_v3 = vperm.slane %v884_v0, %v2532_v50  ;;  %v2553_v13 = vperm.slane %v870_v4, %v2532_v50  ;;  %v897_v16 = vrot.slane %v888_v62, 4  ;;  %v920_v18 = vperm.slane %v914_v10, %v2524_v39 }
 0x1c4   : > { %v818_v5 = vpop.f32.mrf.mxu3  ;;  %v872_v6 = vsel %vm845_vm2, %v864_v47, %v871_v1 }
 0x1c5   : > { %v901_v7 = vrot.slane %v818_v5, 4  ;;  %v904_v8 = vsel %vm845_vm2, %v818_v5, %v903_v60  ;;  %978 = vrot.lane.b32.xlu2 %v892_v3, %s2231_s24  ;;  %v880_v9 = vperm.slane %v872_v6, %v2532_v50  ;;  %v893_v21 = vrot.slane %v2553_v13, 4  ;;  %v1469_v60 = vld [vmem:[%s2878_s8] sm:$0xff] }
 0x1c6   : > { %v912_v11 = vperm.slane %v904_v8, %v2524_v39  ;;  %v1125_v12 = vpop.f32.mrf.mxu2  ;;  %v898_v23 = vsel %vm845_vm2, 0.0, %v897_v16  ;;  %v925_v25 = vrot.slane %v920_v18, 4  ;;  %v899_v30 = vrot.slane %v892_v3, 4 }
 0x1c7   : > { %962 = vrot.lane.b32.xlu0 %v880_v9, %s2232_s27  ;;  %v895_v15 = vrot.slane %v880_v9, 4  ;;  %v902_v17 = vsel %vm845_vm2, %v901_v7, %v2518_v29  ;;  %v894_v27 = vsel %vm845_vm2, 0.0, %v893_v21 }
 0x1c8   : > { %v938_v20 = vsel %vm845_vm2, %v937_v14, %v912_v11  ;;  %v908_v22 = vperm.slane %v902_v17, %v2524_v39  ;;  %v939_v32 = vrot.slane %v912_v11, 4  ;;  %v900_v36 = vsel %vm845_vm2, 0.0, %v899_v30 }
 0x1c9   : > { %v896_v19 = vsel %vm845_vm2, 0.0, %v895_v15  ;;  %v944_v24 = vperm.slane %v938_v20, %v2532_v50 }
 0x1ca   : > { %v926_v28 = vsel %vm845_vm2, %v925_v25, %v908_v22  ;;  %v927_v33 = vrot.slane %v908_v22, 4  ;;  %v940_v38 = vsel %vm845_vm2, %v924_v2, %v939_v32 }
 0x1cb   : > { %966 = vrot.lane.b32.xlu1 %v896_v19, %s2233_s29  ;;  %v953_v29 = vrot.slane %v944_v24, 4  ;;  %v2571_v31 = vperm.slane %v926_v28, %v2532_v50  ;;  %v948_v42 = vperm.slane %v940_v38, %v2532_v50 }
 0x1cc   : > { %v928_v40 = vsel %vm845_vm2, %v920_v18, %v927_v33 }
 0x1cd   : > { %974 = vrot.lane.b32.xlu2 %v898_v23, %s2883_s28  ;;  %v954_v34 = vsel %vm845_vm2, 0.0, %v953_v29  ;;  %v949_v37 = vrot.slane %v2571_v31, 4  ;;  %v936_v43 = vperm.slane %v928_v40, %v2532_v50  ;;  %v955_v45 = vrot.slane %v948_v42, 4 }
 0x1ce   : > { %v1128_v26 = vpop.f32.mrf.mxu2 }
 0x1cf   : > { %958 = vrot.lane.b32.xlu0 %v894_v27, %s2881_s30  ;;  %v950_v41 = vsel %vm845_vm2, 0.0, %v949_v37  ;;  %v956_v46 = vsel %vm845_vm2, 0.0, %v955_v45  ;;  %v951_v47 = vrot.slane %v936_v43, 4 }
 0x1d1   : > { %v952_v49 = vsel %vm845_vm2, 0.0, %v951_v47 }
 0x1d3   : > { %998 = vrot.lane.b32.xlu1 %v944_v24, %s2230_s0 }
 0x1d5   : > { %1002 = vrot.lane.b32.xlu2 %v954_v34, %s2883_s28  ;;  %s452_s28 = sand.u32 1, %s2210_s14  }
 0x1d6   : > { %v1131_v35 = vpop.f32.mrf.mxu2 }
 0x1d7   : > { %982 = vrot.lane.b32.xlu0 %v900_v36, %s2885_s11 }
 0x1db   : > { %986 = vrot.lane.b32.xlu1 %v950_v41, %s2881_s30  ;;  %v2642_v41 = vld [vmem:[%s2879_s9] sm:$0xff] }
 0x1dd   : > { %990 = vrot.lane.b32.xlu2 %v936_v43, %s2232_s27 }
 0x1de   : > { %v1134_v44 = vpop.f32.mrf.mxu2 }
 0x1df   : > { %1193 = vmatpush.msra.mxu3 %v1134_v44  ;;  %1006 = vrot.lane.b32.xlu0 %v948_v42, %s2231_s24 }
 0x1e1   : > { %1194 = vmatpush.msra.mxu3 %v1131_v35 }
 0x1e3   : > { %1195 = vmatpush.msra.mxu3 %v1128_v26  ;;  %1010 = vrot.lane.b32.xlu1 %v956_v46, %s2885_s11  ;;  %s492_s11 = scalar_lea.vmem %s2873_s3, %s2056_s20  ;;  %s2892_s20 = smov 80  }
 0x1e4   : > { %v1465_v63 = vld [vmem:[%s492_s11] sm:$0xff]  ;;  %v1466_v4 = vld [vmem:[%s492_s11 + $0x8] sm:$0xff]  ;;  %v1467_v8 = vld [vmem:[%s492_s11 + $0x10] sm:$0xff] }
 0x1e5   : > { %1196 = vmatpush.msra.mxu3 %v1125_v12  ;;  %v1468_v12 = vld [vmem:[%s492_s11 + $0x18] sm:$0xff]  ;;  %s1960_s11 = sshll.u32 %s452_s28, 5 }
 0x1e6   : > { %v1137_v48 = vpop.f32.mrf.mxu2  ;;  %2025 = vmatmul.msk.f32.vlgmr.msra.gmra.mxu3 %vm1015_vm1, %v1173_v53  ;;  %s2636_s30 = scalar_lea.vmem [#allocation2], %s1960_s11  ;;  %s2168_s11 = scalar_lea.hbm %s2880_s10, 64 }
 0x1e7   : > { %994 = vrot.lane.b32.xlu0 %v952_v49, %s2233_s29  ;;  %v2651_v49 = vld [vmem:[%s2879_s9 + $0x8] sm:$0xff] }
 0x1ee   : > { %v1140_v51 = vpop.f32.mrf.mxu2  ;;  %2026 = vmatmul.msk.f32.gmra.mxu3 %vm1015_vm1, %v1174_v55 }
 0x1f6   : > { %v1143_v52 = vpop.f32.mrf.mxu2 }
 0x1fe   : > { %v1146_v54 = vpop.f32.mrf.mxu2 }
 0x1ff   : > { %1216 = vmatpush.msrb.mxu1 %v1146_v54 }
 0x201   : > { %1217 = vmatpush.msrb.mxu1 %v1143_v52 }
 0x203   : > { %1218 = vmatpush.msrb.mxu1 %v1140_v51 }
 0x205   : > { %1219 = vmatpush.msrb.mxu1 %v1137_v48 }
 0x206   : > { %v1149_v56 = vpop.f32.mrf.mxu2  ;;  %2027 = vmatmul.msk.f32.vlgmr.msrb.gmra.mxu1 %vm1015_vm1, %v1173_v53 }
 0x20e   : > { %v1152_v57 = vpop.f32.mrf.mxu2  ;;  %2028 = vmatmul.msk.f32.gmra.mxu1 %vm1015_vm1, %v1174_v55 }
 0x216   : > { %v1155_v58 = vpop.f32.mrf.mxu2 }
 0x21e   : > { %v1158_v59 = vpop.f32.mrf.mxu2 }
 0x21f   : > { %1239 = vmatpush.msrb.mxu3 %v1158_v59  ;;  %v979_v3 = vpop.permute.xlu2 %978 }
 0x221   : > { %1240 = vmatpush.msrb.mxu3 %v1155_v58 }
 0x223   : > { %1241 = vmatpush.msrb.mxu3 %v1152_v57 }
 0x225   : > { %1242 = vmatpush.msrb.mxu3 %v1149_v56 }
 0x226   : > { %v1161_v61 = vpop.f32.mrf.mxu2  ;;  %2029 = vmatmul.msk.f32.vlgmr.msrb.gmra.mxu3 %vm1015_vm1, %v1173_v53 }
 0x227   : > { %1498 = vmatpush.msra.mxu3 %v1469_v60  ;;  %v975_v9 = vpop.permute.xlu2 %974 }
 0x22e   : > { %v1164_v62 = vpop.f32.mrf.mxu2  ;;  %2030 = vmatmul.msk.f32.gmra.mxu3 %vm1015_vm1, %v1174_v55 }
 0x22f   : > { %v1003_v14 = vpop.permute.xlu2 %1002 }
 0x235   : > { %v971_v0 = vpop.permute.xlu1 %970 }
 0x236   : > { %v1167_v1 = vpop.f32.mrf.mxu2  ;;  %2035 = vmatmul.msk.f32.vlgmr.msra.gmra.mxu3 %vm1470_vm3, %v1465_v63 }
 0x237   : > { %v991_v21 = vpop.permute.xlu2 %990 }
 0x239   : > { %v963_v2 = vpop.permute.xlu0 %962 }
 0x23d   : > { %v967_v6 = vpop.permute.xlu1 %966 }
 0x23e   : > { %v1170_v5 = vpop.f32.mrf.mxu2  ;;  %2036 = vmatmul.msk.f32.gmra.mxu3 %vm1470_vm3, %v1466_v4 }
 0x23f   : > { %1262 = vmatpush.msra.mxu1 %v1170_v5 }
 0x241   : > { %1263 = vmatpush.msra.mxu1 %v1167_v1  ;;  %v959_v7 = vpop.permute.xlu0 %958 }
 0x242   : > { %v1014_v15 = vsel %vm1013_vm4, %v2553_v13, %v959_v7 }
 0x243   : > { %1264 = vmatpush.msra.mxu1 %v1164_v62  ;;  %v1016_v17 = vsel %vm1015_vm1, %v1014_v15, %v963_v2 }
 0x244   : > { %v1018_v19 = vsel %vm1017_vm5, %v1016_v17, %v967_v6 }
 0x245   : > { %1265 = vmatpush.msra.mxu1 %v1161_v61  ;;  %v999_v10 = vpop.permute.xlu1 %998  ;;  %v1019_v22 = vsel %vm534_vm0, %v1018_v19, %v971_v0 }
 0x246   : > { %2031 = vmatmul.msk.f32.vlgmr.msra.gmra.mxu1 %vm1015_vm1, %v1173_v53  ;;  %2037 = vmatmul.msk.f32.gmra.mxu3 %vm1470_vm3, %v1467_v8  ;;  %v1021_v26 = vsel %vm1020_vm6, %v1019_v22, %v975_v9 }
 0x249   : > { %v983_v11 = vpop.permute.xlu0 %982 }
 0x24d   : > { %v987_v18 = vpop.permute.xlu1 %986 }
 0x24e   : > { %2032 = vmatmul.msk.f32.gmra.mxu1 %vm1015_vm1, %v1174_v55  ;;  %2038 = vmatmul.msk.f32.gmra.mxu3 %vm1470_vm3, %v1468_v12  ;;  %v1026_v20 = vsel %vm1013_vm4, %v2571_v31, %v987_v18  ;;  %v1023_v31 = vsel %vm1022_vm7, %v1021_v26, %v979_v3 }
 0x24f   : > { %v1027_v24 = vsel %vm1015_vm1, %v1026_v20, %v991_v21  ;;  %v1025_v33 = vsel %vm1024_vm8, %v1023_v31, %v983_v11 }
 0x251   : > { %v1007_v16 = vpop.permute.xlu0 %1006 }
 0x255   : > { %v1011_v28 = vpop.permute.xlu1 %1010 }
 0x259   : > { %v995_v23 = vpop.permute.xlu0 %994 }
 0x25a   : > { %v1028_v13 = vsel %vm1017_vm5, %v1027_v24, %v995_v23 }
 0x25b   : > { %v1029_v25 = vsel %vm534_vm0, %v1028_v13, %v999_v10 }
 0x25c   : > { %v1030_v27 = vsel %vm1020_vm6, %v1029_v25, %v1003_v14 }
 0x25d   : > { %v1031_v29 = vsel %vm1022_vm7, %v1030_v27, %v1007_v16 }
 0x25e   : > { %v1032_v30 = vsel %vm1024_vm8, %v1031_v29, %v1011_v28 }
 0x25f   : > { %v1035_v32 = vrot.slane %v1032_v30, 4 }
 0x261   : > { %v1037_v34 = vsel %vm1036_vm9, %v1025_v33, %v1035_v32 }
 0x262   : > { %1039 = vst [vmem:[%s2636_s30] sm:$0xff] %v1037_v34 }
 0x269   : > { %v1198_v35 = vpop.f32.mrf.mxu3 }
 0x26a   : > { %v1275_v44 = vrot.slane %v1198_v35, 4 }
 0x271   : > { %v1201_v36 = vpop.f32.mrf.mxu3 }
 0x272   : > { %v1331_v2 = vrot.slane %v1201_v36, 4 }
 0x283   : > { %v1221_v38 = vpop.f32.mrf.mxu1 }
 0x284   : > { %v1287_v48 = vrot.slane %v1221_v38, 4 }
 0x28b   : > { %v1224_v43 = vpop.f32.mrf.mxu1 }
 0x28c   : > { %v1343_v0 = vrot.slane %v1224_v43, 4 }
 0x2a9   : > { %v1244_v37 = vpop.f32.mrf.mxu3 }
 0x2aa   : > { %v1273_v45 = vrot.slane %v1244_v37, 4  ;;  %v1276_v46 = vsel %vm845_vm2, %v1244_v37, %v1275_v44 }
 0x2ab   : > { %v1284_v51 = vperm.slane %v1276_v46, %v2524_v39 }
 0x2ac   : > { %v1274_v47 = vsel %vm845_vm2, %v1273_v45, %v1198_v35 }
 0x2ad   : > { %v1280_v53 = vperm.slane %v1274_v47, %v2524_v39  ;;  %v1311_v57 = vrot.slane %v1284_v51, 4 }
 0x2af   : > { %v1299_v60 = vrot.slane %v1280_v53, 4 }
 0x2b1   : > { %v1247_v40 = vpop.f32.mrf.mxu3 }
 0x2b2   : > { %v1329_v8 = vrot.slane %v1247_v40, 4  ;;  %v1332_v9 = vsel %vm845_vm2, %v1247_v40, %v1331_v2 }
 0x2b3   : > { %v1340_v16 = vperm.slane %v1332_v9, %v2524_v39 }
 0x2b4   : > { %v1330_v18 = vsel %vm845_vm2, %v1329_v8, %v1201_v36 }
 0x2b5   : > { %v1336_v25 = vperm.slane %v1330_v18, %v2524_v39  ;;  %v1367_v26 = vrot.slane %v1340_v16, 4 }
 0x2b7   : > { %v1355_v33 = vrot.slane %v1336_v25, 4 }
 0x2b9   : > { %v1500_v42 = vpop.f32.mrf.mxu3 }
 0x2ba   : > { %1535 = vmatpush.msrb.mxu1 %v1500_v42 }
 0x2bb   : > { %2039 = vmatmul.msk.f32.vlgmr.msrb.gmra.mxu1 %vm1470_vm3, %v2642_v41 }
 0x2c1   : > { %v1503_v52 = vpop.f32.mrf.mxu3 }
 0x2c2   : > { %1558 = vmatpush.msra.mxu1 %v1503_v52 }
 0x2c3   : > { %v1267_v54 = vpop.f32.mrf.mxu1  ;;  %2040 = vmatmul.msk.f32.gmra.mxu1 %vm1470_vm3, %v2651_v49 }
 0x2c4   : > { %v1285_v55 = vrot.slane %v1267_v54, 4  ;;  %v1288_v56 = vsel %vm845_vm2, %v1267_v54, %v1287_v48 }
 0x2c5   : > { %v1296_v58 = vperm.slane %v1288_v56, %v2524_v39 }
 0x2c6   : > { %v1286_v59 = vsel %vm845_vm2, %v1285_v55, %v1221_v38 }
 0x2c7   : > { %v1292_v61 = vperm.slane %v1286_v59, %v2524_v39  ;;  %v1309_v62 = vrot.slane %v1296_v58, 4  ;;  %v1312_v63 = vsel %vm845_vm2, %v1296_v58, %v1311_v57 }
 0x2c8   : > { %v1320_v1 = vperm.slane %v1312_v63, %v2532_v50 }
 0x2c9   : > { %v1506_v3 = vpop.f32.mrf.mxu3  ;;  %v1310_v4 = vsel %vm845_vm2, %v1309_v62, %v1284_v51  ;;  %v1300_v5 = vsel %vm845_vm2, %v1292_v61, %v1299_v60  ;;  %v1297_v11 = vrot.slane %v1292_v61, 4 }
 0x2ca   : > { %1581 = vmatpush.msrb.mxu3 %v1506_v3  ;;  %1406 = vrot.lane.b32.xlu1 %v1320_v1, %s2231_s24  ;;  %v1316_v6 = vperm.slane %v1310_v4, %v2532_v50  ;;  %v1308_v7 = vperm.slane %v1300_v5, %v2532_v50  ;;  %v1327_v20 = vrot.slane %v1320_v1, 4 }
 0x2cb   : > { %v1270_v10 = vpop.f32.mrf.mxu1  ;;  %2041 = vmatmul.msk.f32.vlgmr.msra.gmra.mxu1 %vm1470_vm3, %v2642_v41  ;;  %2043 = vmatmul.msk.f32.vlgmr.msrb.gmra.mxu3 %vm1470_vm3, %v2642_v41  ;;  %v1298_v23 = vsel %vm845_vm2, %v1297_v11, %v1280_v53 }
 0x2cc   : > { %v1341_v12 = vrot.slane %v1270_v10, 4  ;;  %v1344_v14 = vsel %vm845_vm2, %v1270_v10, %v1343_v0  ;;  %1398 = vrot.lane.b32.xlu2 %v1316_v6, %s2230_s0  ;;  %1390 = vrot.lane.b32.xlu0 %v1308_v7, %s2232_s27  ;;  %v1323_v15 = vrot.slane %v1308_v7, 4  ;;  %v1325_v21 = vrot.slane %v1316_v6, 4 }
 0x2cd   : > { %v1352_v19 = vperm.slane %v1344_v14, %v2524_v39  ;;  %v1328_v28 = vsel %vm845_vm2, 0.0, %v1327_v20  ;;  %v1304_v30 = vperm.slane %v1298_v23, %v2532_v50 }
 0x2ce   : > { %v1342_v17 = vsel %vm845_vm2, %v1341_v12, %v1224_v43  ;;  %v1324_v24 = vsel %vm845_vm2, 0.0, %v1323_v15  ;;  %v1326_v29 = vsel %vm845_vm2, 0.0, %v1325_v21 }
 0x2cf   : > { %v1348_v22 = vperm.slane %v1342_v17, %v2524_v39  ;;  %v1365_v27 = vrot.slane %v1352_v19, 4  ;;  %v1368_v32 = vsel %vm845_vm2, %v1352_v19, %v1367_v26  ;;  %v1321_v34 = vrot.slane %v1304_v30, 4 }
 0x2d0   : > { %v1376_v36 = vperm.slane %v1368_v32, %v2532_v50 }
 0x2d1   : > { %v1509_v13 = vpop.f32.mrf.mxu3  ;;  %v1353_v31 = vrot.slane %v1348_v22, 4  ;;  %v1366_v35 = vsel %vm845_vm2, %v1365_v27, %v1340_v16  ;;  %v1356_v37 = vsel %vm845_vm2, %v1348_v22, %v1355_v33  ;;  %v1322_v42 = vsel %vm845_vm2, 0.0, %v1321_v34 }
 0x2d2   : > { %1394 = vrot.lane.b32.xlu1 %v1324_v24, %s2233_s29  ;;  %1604 = vmatpush.msrb.mxu1 %v1509_v13  ;;  %v1372_v40 = vperm.slane %v1366_v35, %v2532_v50  ;;  %v1364_v43 = vperm.slane %v1356_v37, %v2532_v50  ;;  %v1383_v48 = vrot.slane %v1376_v36, 4 }
 0x2d3   : > { %2042 = vmatmul.msk.f32.gmra.mxu1 %vm1470_vm3, %v2651_v49  ;;  %2044 = vmatmul.msk.f32.gmra.mxu3 %vm1470_vm3, %v2651_v49  ;;  %v1354_v38 = vsel %vm845_vm2, %v1353_v31, %v1336_v25 }
 0x2d4   : > { %1410 = vrot.lane.b32.xlu2 %v1328_v28, %s2891_s12  ;;  %1402 = vrot.lane.b32.xlu0 %v1326_v29, %s2892_s20  ;;  %v1360_v44 = vperm.slane %v1354_v38, %v2532_v50  ;;  %v1379_v45 = vrot.slane %v1364_v43, 4  ;;  %v1384_v51 = vsel %vm845_vm2, 0.0, %v1383_v48  ;;  %v1381_v52 = vrot.slane %v1372_v40, 4 }
 0x2d6   : > { %v1377_v46 = vrot.slane %v1360_v44, 4  ;;  %v1380_v47 = vsel %vm845_vm2, 0.0, %v1379_v45  ;;  %v1382_v53 = vsel %vm845_vm2, 0.0, %v1381_v52 }
 0x2da   : > { %1434 = vrot.lane.b32.xlu1 %v1376_v36, %s2231_s24 }
 0x2db   : > { %2045 = vmatmul.msk.f32.vlgmr.msrb.gmra.mxu1 %vm1470_vm3, %v2642_v41  ;;  %v1378_v41 = vsel %vm845_vm2, 0.0, %v1377_v46 }
 0x2dc   : > { %1386 = vrot.lane.b32.xlu2 %v1322_v42, %s2893_s22  ;;  %1426 = vrot.lane.b32.xlu0 %v1372_v40, %s2230_s0 }
 0x2e2   : > { %1418 = vrot.lane.b32.xlu1 %v1364_v43, %s2232_s27 }
 0x2e3   : > { %2046 = vmatmul.msk.f32.gmra.mxu1 %vm1470_vm3, %v2651_v49 }
 0x2e4   : > { %1422 = vrot.lane.b32.xlu2 %v1380_v47, %s2233_s29  ;;  %1414 = vrot.lane.b32.xlu0 %v1378_v41, %s2893_s22 }
 0x2ea   : > { %1438 = vrot.lane.b32.xlu1 %v1384_v51, %s2891_s12 }
 0x2f2   : > { %1430 = vrot.lane.b32.xlu1 %v1382_v53, %s2892_s20 }
 0x326   : > { %v1399_v57 = vpop.permute.xlu2 %1398 }
 0x32e   : > { %v2721_v61 = vpop.permute.xlu2 %1410 }
 0x336   : > { %v1387_v5 = vpop.permute.xlu2 %1386 }
 0x337   : > { %v1441_v17 = vsel %vm1013_vm4, %v1304_v30, %v1387_v5 }
 0x338   : > { %v1537_v54 = vpop.f32.mrf.mxu1 }
 0x339   : > { %v1614_v6 = vrot.slane %v1537_v54, 4 }
 0x33c   : > { %v2719_v49 = vpop.permute.xlu1 %1406 }
 0x33e   : > { %v1391_v55 = vpop.permute.xlu0 %1390  ;;  %v1423_v37 = vpop.permute.xlu2 %1422 }
 0x33f   : > { %v1442_v20 = vsel %vm1015_vm1, %v1441_v17, %v1391_v55 }
 0x340   : > { %v1540_v56 = vpop.f32.mrf.mxu1 }
 0x341   : > { %v1670_v9 = vrot.slane %v1540_v56, 4 }
 0x344   : > { %v1395_v58 = vpop.permute.xlu1 %1394 }
 0x345   : > { %v1443_v27 = vsel %vm1017_vm5, %v1442_v20, %v1395_v58 }
 0x346   : > { %v1403_v59 = vpop.permute.xlu0 %1402  ;;  %v1444_v38 = vsel %vm534_vm0, %v1443_v27, %v1399_v57 }
 0x347   : > { %v1445_v48 = vsel %vm1020_vm6, %v1444_v38, %v1403_v59 }
 0x348   : > { %v1560_v60 = vpop.f32.mrf.mxu1  ;;  %v1446_v59 = vsel %vm1022_vm7, %v1445_v48, %v2719_v49 }
 0x349   : > { %v1626_v7 = vrot.slane %v1560_v60, 4 }
 0x34c   : > { %v2723_v62 = vpop.permute.xlu1 %1434 }
 0x34e   : > { %v1583_v63 = vpop.f32.mrf.mxu3  ;;  %v1427_v0 = vpop.permute.xlu0 %1426 }
 0x34f   : > { %v1612_v2 = vrot.slane %v1583_v63, 4  ;;  %v1615_v14 = vsel %vm845_vm2, %v1583_v63, %v1614_v6 }
 0x350   : > { %v1563_v1 = vpop.f32.mrf.mxu1  ;;  %v2738_v23 = vperm.slane %v1615_v14, %v2524_v39 }
 0x351   : > { %v1613_v4 = vsel %vm845_vm2, %v1612_v2, %v1537_v54  ;;  %v1682_v33 = vrot.slane %v1563_v1, 4 }
 0x352   : > { %v1619_v10 = vperm.slane %v1613_v4, %v2524_v39 }
 0x354   : > { %v1419_v3 = vpop.permute.xlu1 %1418  ;;  %v1638_v24 = vrot.slane %v1619_v10, 4 }
 0x356   : > { %v1586_v8 = vpop.f32.mrf.mxu3  ;;  %v1415_v11 = vpop.permute.xlu0 %1414 }
 0x357   : > { %v1671_v18 = vsel %vm845_vm2, %v1586_v8, %v1670_v9  ;;  %v1448_v21 = vsel %vm1013_vm4, %v1360_v44, %v1415_v11  ;;  %v1668_v34 = vrot.slane %v1586_v8, 4  ;;  %v1650_v11 = vrot.slane %v2738_v23, 4 }
 0x358   : > { %v1606_v12 = vpop.f32.mrf.mxu1  ;;  %v1679_v28 = vperm.slane %v1671_v18, %v2524_v39  ;;  %v1449_v29 = vsel %vm1015_vm1, %v1448_v21, %v1419_v3 }
 0x359   : > { %v1624_v15 = vrot.slane %v1606_v12, 4  ;;  %v1627_v16 = vsel %vm845_vm2, %v1606_v12, %v1626_v7  ;;  %v1450_v45 = vsel %vm1017_vm5, %v1449_v29, %v1423_v37  ;;  %v1669_v51 = vsel %vm845_vm2, %v1668_v34, %v1540_v56 }
 0x35a   : > { %v2732_v19 = vperm.slane %v1627_v16, %v2524_v39  ;;  %v1706_v47 = vrot.slane %v1679_v28, 4  ;;  %v1451_v53 = vsel %vm534_vm0, %v1450_v45, %v1427_v0  ;;  %v1675_v56 = vperm.slane %v1669_v51, %v2524_v39 }
 0x35b   : > { %v1625_v22 = vsel %vm845_vm2, %v1624_v15, %v1560_v60  ;;  %v1447_v7 = vsel %vm1024_vm8, %v1446_v59, %v2721_v61 }
 0x35c   : > { %v1631_v13 = vperm.slane %v1625_v22, %v2524_v39  ;;  %v1648_v25 = vrot.slane %v2732_v19, 4  ;;  %v1439_v26 = vpop.permute.xlu1 %1438  ;;  %v1651_v15 = vsel %vm845_vm2, %v2732_v19, %v1650_v11 }
 0x35d   : > { %v1659_v16 = vperm.slane %v1651_v15, %v2532_v50 }
 0x35e   : > { %v1636_v30 = vrot.slane %v1631_v13, 4  ;;  %v1649_v31 = vsel %vm845_vm2, %v1648_v25, %v2738_v23  ;;  %v1639_v32 = vsel %vm845_vm2, %v1631_v13, %v1638_v24 }
 0x35f   : > { %v1655_v35 = vperm.slane %v1649_v31, %v2532_v50  ;;  %v1647_v36 = vperm.slane %v1639_v32, %v2532_v50 }
 0x360   : > { %v1609_v40 = vpop.f32.mrf.mxu1  ;;  %v1637_v42 = vsel %vm845_vm2, %v1636_v30, %v1619_v10 }
 0x361   : > { %v1680_v43 = vrot.slane %v1609_v40, 4  ;;  %v1683_v44 = vsel %vm845_vm2, %v1609_v40, %v1682_v33  ;;  %1737 = vrot.lane.b32.xlu2 %v1655_v35, %s2230_s0  ;;  %1729 = vrot.lane.b32.xlu0 %v1647_v36, %s2232_s27  ;;  %v2757_v46 = vperm.slane %v1637_v42, %v2532_v50  ;;  %v1662_v55 = vrot.slane %v1647_v36, 4 }
 0x362   : > { %v1691_v41 = vperm.slane %v1683_v44, %v2524_v39  ;;  %v1664_v10 = vrot.slane %v1655_v35, 4 }
 0x363   : > { %v1660_v52 = vrot.slane %v2757_v46, 4  ;;  %v1681_v58 = vsel %vm845_vm2, %v1680_v43, %v1563_v1  ;;  %v1663_v6 = vsel %vm845_vm2, 0.0, %v1662_v55 }
 0x364   : > { %v1431_v54 = vpop.permute.xlu1 %1430  ;;  %v1707_v57 = vsel %vm845_vm2, %v1691_v41, %v1706_v47  ;;  %v1704_v60 = vrot.slane %v1691_v41, 4  ;;  %v1687_v4 = vperm.slane %v1681_v58, %v2524_v39  ;;  %v1665_v12 = vsel %vm845_vm2, 0.0, %v1664_v10 }
 0x365   : > { %v1452_v63 = vsel %vm1020_vm6, %v1451_v53, %v1431_v54  ;;  %v1661_v2 = vsel %vm845_vm2, 0.0, %v1660_v52  ;;  %v1715_v1 = vperm.slane %v1707_v57, %v2532_v50 }
 0x366   : > { %v1453_v0 = vsel %vm1022_vm7, %v1452_v63, %v2723_v62  ;;  %1725 = vrot.lane.b32.xlu1 %v1661_v2, %s2893_s22  ;;  %v1705_v49 = vsel %vm845_vm2, %v1704_v60, %v1679_v28  ;;  %v1694_v62 = vrot.slane %v1675_v56, 4  ;;  %v1692_v14 = vrot.slane %v1687_v4, 4 }
 0x367   : > { %v1454_v3 = vsel %vm1024_vm8, %v1453_v0, %v1439_v26  ;;  %v1711_v9 = vperm.slane %v1705_v49, %v2532_v50  ;;  %v1722_v24 = vrot.slane %v1715_v1, 4  ;;  %v1666_v26 = vrot.slane %v1659_v16, 4 }
 0x368   : > { %v1457_v5 = vrot.slane %v1454_v3, 4  ;;  %v1695_v39 = vsel %vm845_vm2, %v1687_v4, %v1694_v62  ;;  %v1693_v20 = vsel %vm845_vm2, %v1692_v14, %v1675_v56 }
 0x369   : > { %1733 = vrot.lane.b32.xlu2 %v1663_v6, %s2233_s29  ;;  %1773 = vrot.lane.b32.xlu0 %v1715_v1, %s2231_s24  ;;  %v1703_v61 = vperm.slane %v1695_v39, %v2532_v50  ;;  %v1720_v18 = vrot.slane %v1711_v9, 4  ;;  %v1699_v23 = vperm.slane %v1693_v20, %v2532_v50  ;;  %v1723_v25 = vsel %vm845_vm2, 0.0, %v1722_v24 }
 0x36a   : > { %v1458_v8 = vsel %vm1036_vm9, %v1447_v7, %v1457_v5  ;;  %v1667_v27 = vsel %vm845_vm2, 0.0, %v1666_v26 }
 0x36b   : > { %2033 = vst [vmem:[%s2636_s30 + $0x8] sm:$0xff] %v1458_v8  ;;  %v1718_v17 = vrot.slane %v1703_v61, 4  ;;  %v1721_v22 = vsel %vm845_vm2, 0.0, %v1720_v18  ;;  %v1716_v19 = vrot.slane %v1699_v23, 4 }
 0x36d   : > { %v1719_v21 = vsel %vm845_vm2, 0.0, %v1718_v17  ;;  %v1717_v13 = vsel %vm845_vm2, 0.0, %v1716_v19 }
 0x36e   : > { %1765 = vrot.lane.b32.xlu1 %v1711_v9, %s2230_s0  ;;  %s2055_s0 = sshll.u32 %s2360_s19, 3  ;;  %s2057_s19 = sshll.u32 %s2218_s16, 5 }
 0x36f   : > { %s1802_s16 = scalar_lea.sflag [#allocation3], %s452_s28 }
 0x371   : > { %1741 = vrot.lane.b32.xlu2 %v1665_v12, %s2892_s20  ;;  %1757 = vrot.lane.b32.xlu0 %v1703_v61, %s2232_s27 }
 0x376   : > { %1745 = vrot.lane.b32.xlu1 %v1659_v16, %s2231_s24 }
 0x379   : > { %1761 = vrot.lane.b32.xlu2 %v1719_v21, %s2233_s29  ;;  %1769 = vrot.lane.b32.xlu0 %v1721_v22, %s2892_s20  ;;  %s483_s29 = scalar_lea.vmem %s2872_s2, %s2055_s0  ;;  %s1815_s20 = scalar_lea.hbm %s2880_s10, %s2057_s19 }
 0x37a   : > { %v1462_v31 = vld [vmem:[%s483_s29] sm:$0xff]  ;;  %s1818_s0 = sshll.u32 %s1815_s20, 4  ;;  %s1819_s0 = int_to_ptr.hbm [resolvable:$true] %s1818_s0 }
 0x37b   : > { %2034 = vst [vmem:[%s2636_s30 + $0x10] sm:$0xff] %v1462_v31  ;;  %s2162_s24 = sshra.s32 %s1819_s0, 4  ;;  %s2163_s24 = int_to_ptr.hbm [resolvable:$true] %s2162_s24 }
 0x37c   : > { %s2164_s27 = scalar_lea.hbm %s2163_s24, 32  ;;  %p2169_p1 = scmp.lt.s32.totalorder %s2163_s24, %s2880_s10 }
 0x37d   : > { %p2165_p12 = scmp.ne.s32.totalorder %s2163_s24, %s2164_s27  ;;  %p2170_p2 = scmp.lt.s32.totalorder %s2168_s11, %s2164_s27 }
 0x37f   : > { %p2166_p13 = pnand %p2165_p12, %p2334_p4  ;;  %p2171_p3 = por %p2170_p2, %p2169_p1 }
 0x381   : > { %1753 = vrot.lane.b32.xlu2 %v1717_v13, %s2893_s22  ;;  %1777 = vrot.lane.b32.xlu0 %v1723_v25, %s2891_s12  ;;  %s1816_s22 = sshll.u32 %s2636_s30, 4  ;;  %p2167_p0 = pneg %p2166_p13  ;;  %s1817_s22 = int_to_ptr.vmem [resolvable:$true] %s1816_s22 }
 0x383   : > { %p2172_p5 = pnand %p2171_p3, %p2167_p0 }
 0x389   : > { %1749 = vrot.lane.b32.xlu2 %v1667_v27, %s2891_s12 }
 0x3bb   : > { %v1738_v50 = vpop.permute.xlu2 %1737 }
 0x3c3   : > { %v1734_v28 = vpop.permute.xlu2 %1733 }
 0x3cb   : > { %v1742_v29 = vpop.permute.xlu2 %1741 }
 0x3d3   : > { %v1730_v30 = vpop.permute.xlu0 %1729  ;;  %v1762_v32 = vpop.permute.xlu2 %1761 }
 0x3d8   : > { %v1726_v34 = vpop.permute.xlu1 %1725 }
 0x3d9   : > { %v1780_v37 = vsel %vm1013_vm4, %v2757_v46, %v1726_v34 }
 0x3da   : > { %v1781_v42 = vsel %vm1015_vm1, %v1780_v37, %v1730_v30 }
 0x3db   : > { %v1774_v33 = vpop.permute.xlu0 %1773  ;;  %v1754_v36 = vpop.permute.xlu2 %1753  ;;  %v1782_v45 = vsel %vm1017_vm5, %v1781_v42, %v1734_v28 }
 0x3dc   : > { %v1787_v40 = vsel %vm1013_vm4, %v1699_v23, %v1754_v36  ;;  %v1783_v41 = vsel %vm534_vm0, %v1782_v45, %v1738_v50 }
 0x3dd   : > { %v1784_v52 = vsel %vm1020_vm6, %v1783_v41, %v1742_v29 }
 0x3e0   : > { %v1766_v38 = vpop.permute.xlu1 %1765 }
 0x3e3   : > { %v1758_v35 = vpop.permute.xlu0 %1757  ;;  %v1750_v58 = vpop.permute.xlu2 %1749 }
 0x3e4   : > { %v1788_v43 = vsel %vm1015_vm1, %v1787_v40, %v1758_v35 }
 0x3e5   : > { %v1789_v47 = vsel %vm1017_vm5, %v1788_v43, %v1762_v32 }
 0x3e6   : > { %v1790_v48 = vsel %vm534_vm0, %v1789_v47, %v1766_v38 }
 0x3e8   : > { %v1746_v46 = vpop.permute.xlu1 %1745 }
 0x3e9   : > { %v1785_v53 = vsel %vm1022_vm7, %v1784_v52, %v1746_v46 }
 0x3ea   : > { %v1786_v63 = vsel %vm1024_vm8, %v1785_v53, %v1750_v58 }
 0x3eb   : > { %v1770_v44 = vpop.permute.xlu0 %1769 }
 0x3ec   : > { %v1791_v51 = vsel %vm1020_vm6, %v1790_v48, %v1770_v44 }
 0x3ed   : > { %v1792_v55 = vsel %vm1022_vm7, %v1791_v51, %v1774_v33 }
 0x3f3   : > { %v1778_v54 = vpop.permute.xlu0 %1777 }
 0x3f4   : > { %v1793_v57 = vsel %vm1024_vm8, %v1792_v55, %v1778_v54 }
 0x3f5   : > { %v1796_v60 = vrot.slane %v1793_v57, 4 }
 0x3f7   : > { %v1797_v2 = vsel %vm1036_vm9, %v1786_v63, %v1796_v60 }
 0x3f8   : > { %2047 = vst [vmem:[%s2636_s30 + $0x18] sm:$0xff] %v1797_v2 }
 0x3f9   : > { %2175 = shalt.err (!%p2172_p5)
}
 0x3fa   : > { %s2237_s28 = smov 128   ;;  %s2238_s30 = smov 8  }
 0x3fb   : > { %2082 = dma.vmem_to_hbm [thread:$0]  (%p2334_p4), %s1817_s22, 512, %s1819_s0, %s1802_s16, %s2237_s28, %s2237_s28, %s2238_s30  }
 0x3fc PF: > { %p2088_p6 = scmp.ge.s32.totalorder %s2226_s18, 2  ;;  %s1833_s29 = sand.u32 1, %s2206_s13  }
 0x3fd   : > { %s1834_s19 = scalar_lea.sflag [#allocation3], %s1833_s29 }
 0x3fe   : > { %p2085_p7 = pnand %p2088_p6, %p2341_p8 }
 0x400   : > { %p2086_p9 = pneg %p2085_p7 }
 0x402   : > { %2201 = dma.done.wait (%p2086_p9), %s1834_s19, 512  }
 0x403   : > { %2203 = vsyncadd (%p2086_p9), %s1834_s19, 4294966784  ;;  %s23_s18 = sadd.s32 1, %s2226_s18   ;;  %s2894_s13 = smov %s2210_s14 }
 0x404   : > { %p20_p10 = scmp.ge.s32.totalorder %s23_s18, 4   ;;  %s2895_s14 = smov %s2214_s15 }
 0x405   : > { %s2896_s15 = smov %s2347_s26  ;;  %s2897_s16 = smov %s2222_s17 }
 0x406   : > { %s2898_s17 = smov %s2900_s21  ;;  %22 = sbr.rel (!%p20_p10) target bundleno = 6 (0x6), region = 107 }
 0x40b   :  { %1840 = vsyncpa [#allocation3], 1 }
 0x40c   :  { %1842 = vsyncpa [#allocation3 + $0x1], 1 }

</bundles_post_ra>
